<compile_context>
chip_gen: v7x
topology: tpu7x:2x2x1
jax: 0.10.0
libtpu: 0.0.40
codegen_flags: <defaults>
</compile_context>

<pallas_src>
import functools

import jax
import jax.numpy as jnp
from jax.experimental import pallas as pl
from jax.experimental.pallas import tpu as pltpu


_SINGLE_BUFFER_MIN_BYTES = 4 * 1024 * 1024   # single-buffer constant weights above this


def _round_up(x, m):
    return ((x + m - 1) // m) * m


def _vmem_limit_bytes():
    """Per-generation VMEM budget: ~75% of physical (v5e/v6e 128 MiB, v7x 64 MiB)."""
    try:
        return int(pltpu.get_tpu_info().vmem_capacity_bytes * 0.75)
    except Exception:
        return 64 * 1024 * 1024


_VMEM_LIMIT = _vmem_limit_bytes()


def _choose_time_chunk(t, b_pad, gate_width):
    """Timesteps per grid step: target ~256 MXU rows, bounded by T and an 8 MiB xg cap."""
    target_rows = 256
    tt = max(1, target_rows // b_pad)
    tt = min(tt, _round_up(t, 8))                       # don't over-pad short sequences
    max_rows = (8 * 1024 * 1024) // (gate_width * 2)    # bf16 xg scratch cap
    tt = max(1, min(tt, max(1, max_rows // b_pad)))
    return tt


def _const_spec(shape, single_buffer):
    """BlockSpec for a grid-invariant (weight) operand; optionally single-buffered."""
    idx = lambda c: (0,) * len(shape)
    if single_buffer:
        try:
            return pl.BlockSpec(shape, idx, pipeline_mode=pl.Buffered(1))
        except Exception:
            pass
    return pl.BlockSpec(shape, idx)


# ----------------------------- LSTM layer kernel -----------------------------
def _lstm_layer_kernel(x_ref, wih_ref, whh_ref, b_ref, out_ref, h_sc, c_sc, xg_sc):
    """One LSTM layer, one time-chunk per grid step.

    x_ref   : (TT*B, Din) bf16   flat time-major chunk input (row = t*B + b)
    wih_ref : (Din, 4H)   bf16   fused input->gate weights  (gate cols i, f, o, g)
    whh_ref : (H, 4H)     bf16   fused hidden->gate weights
    b_ref   : (1, 4H)     f32    combined bias (b_ih + b_hh)
    out_ref : (TT*B, H)   bf16   hidden states for this chunk
    h_sc    : (B, H)      bf16   VMEM scratch carrying h across grid steps
    c_sc    : (B, H)      f32    VMEM scratch carrying c across grid steps
    xg_sc   : (TT*B, 4H)  bf16   VMEM scratch for the precomputed input gates
    """
    batch, hidden = h_sc.shape
    num_steps = out_ref.shape[0] // batch
    H = hidden

    @pl.when(pl.program_id(0) == 0)
    def _():
        h_sc[...] = jnp.zeros_like(h_sc)
        c_sc[...] = jnp.zeros_like(c_sc)

    # Hoisted input projection: one (TT*B, Din) x (Din, 4H) GEMM for the whole chunk,
    # bias folded in.  Only the W_hh matmul remains inside the recurrence.
    xg = (jnp.dot(x_ref[...], wih_ref[...], preferred_element_type=jnp.float32)
          + b_ref[...])
    xg_sc[...] = xg.astype(xg_sc.dtype)

    def step(t, carry):
        h_bf, c = carry                                   # bf16 (B,H), f32 (B,H)
        row = pl.multiple_of(t * batch, batch)
        # TODO(synk): with tiny B, W_hh is re-streamed into the MXU every step;
        # pltpu.matmul_push_rhs could hold it stationary across the chunk.
        gates = xg_sc[pl.ds(row, batch), :] + jnp.dot(
            h_bf, whh_ref[...], preferred_element_type=jnp.float32)   # (B, 4H) f32
        sg = jax.nn.sigmoid(gates[:, : 3 * H])            # lane-aligned (i, f, o)
        i_g = sg[:, 0 * H:1 * H]
        f_g = sg[:, 1 * H:2 * H]
        o_g = sg[:, 2 * H:3 * H]
        g_g = jnp.tanh(gates[:, 3 * H:4 * H])
        c_new = f_g * c + i_g * g_g
        h_new = (o_g * jnp.tanh(c_new)).astype(jnp.bfloat16)
        out_ref[pl.ds(row, batch), :] = h_new
        return h_new, c_new

    h_fin, c_fin = jax.lax.fori_loop(
        0, num_steps, step, (h_sc[...], c_sc[...]), unroll=True)
    h_sc[...] = h_fin
    c_sc[...] = c_fin


def lstm_layer(x_flat, wih_t, whh_t, bias, *, batch, time_chunk, vmem_limit):
    """x_flat: (T_pad*B_pad, Din) bf16, time-major flat. Returns same layout, width H."""
    TB, Din = x_flat.shape
    H = whh_t.shape[0]
    rows = time_chunk * batch
    n_chunks = TB // rows
    big_w = wih_t.size * 2 >= _SINGLE_BUFFER_MIN_BYTES    # bf16 bytes

    # TODO(synk): on v7x a leading 'parallel' grid axis splitting the padded batch across
    # the two TensorCores would ~2x the recurrence; omitted (regresses single-core chips).
    return pl.pallas_call(
        _lstm_layer_kernel,
        out_shape=jax.ShapeDtypeStruct((TB, H), jnp.bfloat16),
        grid_spec=pltpu.PrefetchScalarGridSpec(
            num_scalar_prefetch=0,
            grid=(n_chunks,),
            in_specs=[
                pl.BlockSpec((rows, Din), lambda c: (c, 0)),
                _const_spec((Din, 4 * H), big_w),
                _const_spec((H, 4 * H), big_w),
                _const_spec((1, 4 * H), False),
            ],
            out_specs=pl.BlockSpec((rows, H), lambda c: (c, 0)),
            scratch_shapes=[
                pltpu.VMEM((batch, H), jnp.bfloat16),       # h state (bf16: feeds MXU)
                pltpu.VMEM((batch, H), jnp.float32),        # c state (f32)
                pltpu.VMEM((rows, 4 * H), jnp.bfloat16),    # precomputed x-gates
            ],
        ),
        compiler_params=pltpu.CompilerParams(
            dimension_semantics=("arbitrary",),             # time recurrence is serial
            vmem_limit_bytes=vmem_limit,
        ),
    )(x_flat, wih_t, whh_t, bias)


# ----------------------------- projection kernel -----------------------------
def _proj_kernel(x_ref, w_ref, b_ref, o_ref):
    o_ref[...] = (jnp.dot(x_ref[...], w_ref[...],
                          preferred_element_type=jnp.float32)
                  + b_ref[...]).astype(o_ref.dtype)


def projection(x_flat, w_t, b_row, *, vmem_limit):
    """x_flat: (N, H) bf16, w_t: (H, Vp) bf16, b_row: (1, Vp) f32 -> (N, Vp) f32."""
    N, H = x_flat.shape
    Vp = w_t.shape[-1]
    tm_target, tv_target = 512, 1024

    Np = _round_up(N, 8)
    if Np >= tm_target:
        Np = _round_up(Np, tm_target)
        tm = tm_target
    else:
        tm = Np
    if Vp <= tv_target:
        tv = Vp
    elif Vp % tv_target == 0:
        tv = tv_target
    else:
        tv = 128                                           # Vp is a multiple of 128
    if Np != N:
        x_flat = jnp.pad(x_flat, ((0, Np - N), (0, 0)))

    out = pl.pallas_call(
        _proj_kernel,
        out_shape=jax.ShapeDtypeStruct((Np, Vp), jnp.float32),
        grid_spec=pltpu.PrefetchScalarGridSpec(
            num_scalar_prefetch=0,
            grid=(Np // tm, Vp // tv),
            in_specs=[
                pl.BlockSpec((tm, H), lambda i, j: (i, 0)),
                pl.BlockSpec((H, tv), lambda i, j: (0, j)),
                pl.BlockSpec((1, tv), lambda i, j: (0, j)),
            ],
            out_specs=pl.BlockSpec((tm, tv), lambda i, j: (i, j)),
        ),
        compiler_params=pltpu.CompilerParams(
            dimension_semantics=("parallel", "parallel"),
            vmem_limit_bytes=vmem_limit,
        ),
    )(x_flat, w_t, b_row)
    return out[:N]


# ------------------------------ params / packing ------------------------------
def _pack_lstm_weights(w_ih, w_hh, b_ih, b_hh, h, hp):
    """Fuse, transpose, zero-pad to 128-lane tiles, reorder gates (i,f,g,o)->(i,f,o,g)."""
    order = (0, 1, 3, 2)                                   # i, f, o, g

    def fuse(w):                                           # (4h, h) -> (hp, 4*hp) bf16
        blocks = []
        for g in order:
            gt = w[g * h:(g + 1) * h].T                    # (h_in, h)
            blocks.append(jnp.pad(gt, ((0, hp - h), (0, hp - h))))
        return jnp.concatenate(blocks, axis=1).astype(jnp.bfloat16)

    b = b_ih + b_hh
    bias = jnp.concatenate(
        [jnp.pad(b[g * h:(g + 1) * h], (0, hp - h)) for g in order]
    ).reshape(1, 4 * hp).astype(jnp.float32)
    return fuse(w_ih), fuse(w_hh), bias


def init_params(key, vocab_size, d_model, n_layers):
    D = d_model
    Dp = _round_up(D, 128)
    Vp = _round_up(vocab_size, 128)
    if Vp >= 1024:
        Vp = _round_up(Vp, 1024)                           # 1024-wide proj tiles divide V

    params = {}
    k_emb, key = jax.random.split(key)
    emb = 0.02 * jax.random.normal(k_emb, (vocab_size, D), jnp.float32)
    params["emb"] = jnp.pad(emb, ((0, 0), (0, Dp - D)))    # padded feature cols are zero

    scale = D ** -0.5
    layers = []
    for _ in range(n_layers):
        k1, k2, k3, k4, key = jax.random.split(key, 5)
        w_ih = scale * jax.random.normal(k1, (4 * D, D), jnp.float32)   # rows: i,f,g,o
        w_hh = scale * jax.random.normal(k2, (4 * D, D), jnp.float32)
        b_ih = scale * jax.random.normal(k3, (4 * D,), jnp.float32)
        b_hh = scale * jax.random.normal(k4, (4 * D,), jnp.float32)
        layers.append(_pack_lstm_weights(w_ih, w_hh, b_ih, b_hh, D, Dp))
    params["lstm"] = layers

    k5, k6, _ = jax.random.split(key, 3)
    proj_w = 0.02 * jax.random.normal(k5, (vocab_size, 4 * D), jnp.float32)
    proj_b = 0.02 * jax.random.normal(k6, (vocab_size,), jnp.float32)
    # TODO(synk): reference declares nn.Linear(4*d_model, vocab) but feeds it the LSTM
    # output of width d_model (would raise in PyTorch); we use the first d_model input
    # columns of the declared weight, pre-transposed/padded at init.
    w_t = jnp.pad(proj_w[:, :D].T, ((0, Dp - D), (0, Vp - vocab_size)))
    params["proj_w_t"] = w_t.astype(jnp.bfloat16)                       # (Dp, Vp)
    params["proj_b_row"] = jnp.pad(proj_b, (0, Vp - vocab_size)).reshape(1, Vp)
    return params


# ------------------------------ model forward --------------------------------
@functools.partial(jax.jit, static_argnames=("vocab_size",))
def my_lstm_forward(params, dec_inputs, *, vocab_size):
    """dec_inputs: [B, T] int32. Returns (prob.view(-1, vocab), None)."""
    # Embedding lookup (gather) -- plain JAX glue.
    # TODO(synk): gather has no clean BlockSpec equivalent; kept as XLA gather.
    emb = jnp.take(params["emb"], dec_inputs, axis=0)       # (B, T, Dp) f32
    B, T, Dp = emb.shape

    Bp = _round_up(B, 16)                 # 16 keeps dynamic bf16 sublane offsets aligned
    tt = _choose_time_chunk(T, Bp, 4 * Dp)
    Tp = _round_up(T, tt)

    # Time-major, bf16, padded, flattened so row = t*Bp + b.
    x = jnp.transpose(emb, (1, 0, 2)).astype(jnp.bfloat16)  # (T, B, Dp)
    x = jnp.pad(x, ((0, Tp - T), (0, Bp - B), (0, 0)))
    x = x.reshape(Tp * Bp, Dp)

    for (wih_t, whh_t, bias) in params["lstm"]:
        # TODO(synk): layers round-trip activations through HBM; fusing all layers into
        # one kernel (weights resident) only pays off on 128 MiB VMEM chips (v5e/v6e).
        x = lstm_layer(x, wih_t, whh_t, bias, batch=Bp, time_chunk=tt,
                       vmem_limit=_VMEM_LIMIT)

    Hp = x.shape[-1]
    hidden = x.reshape(Tp, Bp, Hp)[:T, :B]                   # strip time/batch padding
    flat = jnp.transpose(hidden, (1, 0, 2)).reshape(B * T, Hp)   # row = b*T + t

    prob_p = projection(flat, params["proj_w_t"], params["proj_b_row"],
                        vmem_limit=_VMEM_LIMIT)              # (B*T, Vp) f32
    prob = prob_p[:, :vocab_size]
    return prob, None


if __name__ == "__main__":
    vocab_size = 64
    d_model = 32
    n_layers = 2
    batch = 2
    tgt_len = 8

    key = jax.random.PRNGKey(0)
    k_param, k_data = jax.random.split(key)
    params = init_params(k_param, vocab_size, d_model, n_layers)
    dec_inputs = jax.random.randint(
        k_data, (batch, tgt_len), 0, vocab_size, dtype=jnp.int32)

    prob, _ = my_lstm_forward(params, dec_inputs, vocab_size=vocab_size)
    prob = jax.block_until_ready(prob)
    assert prob.shape == (batch * tgt_len, vocab_size)
    assert bool(jnp.all(jnp.isfinite(prob)))
    print("KERNEL_OK")
</pallas_src>

<mosaic_0001>
module attributes {stable_mosaic.version = 11 : i64} {
  func.func @_proj_kernel(%arg0: i32, %arg1: i32, %arg2: memref<16x128xbf16, #tpu.memory_space<vmem>>, %arg3: memref<128x128xbf16, #tpu.memory_space<vmem>>, %arg4: memref<1x128xf32, #tpu.memory_space<vmem>>, %arg5: memref<16x128xf32, #tpu.memory_space<vmem>>) attributes {dimension_semantics = [#tpu.dimension_semantics<parallel>, #tpu.dimension_semantics<parallel>], iteration_bounds = array<i64: 1, 1>, scalar_prefetch = 0 : i64, scratch_operands = 0 : i64, tpu.core_type = #tpu.core_type<tc>, window_params = [{transform_indices = @transform_0, window_bounds = array<i64: 16, 128>}, {transform_indices = @transform_1, window_bounds = array<i64: 128, 128>}, {transform_indices = @transform_2, window_bounds = array<i64: 1, 128>}, {transform_indices = @transform_3, window_bounds = array<i64: 16, 128>}]} {
    %c0 = arith.constant 0 : index
    %c0_0 = arith.constant 0 : index
    %0 = vector.load %arg2[%c0, %c0_0] : memref<16x128xbf16, #tpu.memory_space<vmem>>, vector<16x128xbf16>
    %c0_1 = arith.constant 0 : index
    %c0_2 = arith.constant 0 : index
    %1 = vector.load %arg3[%c0_1, %c0_2] : memref<128x128xbf16, #tpu.memory_space<vmem>>, vector<128x128xbf16>
    %cst = arith.constant dense<0.000000e+00> : vector<16x128xf32>
    %2 = tpu.matmul %0, %1, %cst {dimension_numbers = #tpu.dot_dimension_numbers<[1], [0], [0], [1], [0, 0, 1, 1], [], []>} : vector<16x128xbf16>, vector<128x128xbf16>, vector<16x128xf32> -> vector<16x128xf32>
    %c0_3 = arith.constant 0 : index
    %c0_4 = arith.constant 0 : index
    %3 = vector.load %arg4[%c0_3, %c0_4] : memref<1x128xf32, #tpu.memory_space<vmem>>, vector<1x128xf32>
    %4 = vector.broadcast %3 : vector<1x128xf32> to vector<16x128xf32>
    %5 = arith.addf %2, %4 : vector<16x128xf32>
    %c0_5 = arith.constant 0 : index
    %c0_6 = arith.constant 0 : index
    %6 = vector.load %arg5[%c0_5, %c0_6] : memref<16x128xf32, #tpu.memory_space<vmem>>, vector<16x128xf32>
    tpu.vector_store %arg5[%c0_5, %c0_6], %5 {strides = array<i32>} : memref<16x128xf32, #tpu.memory_space<vmem>>, vector<16x128xf32>,
    return
  }
  func.func @transform_0(%arg0: i32, %arg1: i32) -> (i32, i32) {
    %c0_i32 = arith.constant 0 : i32
    %c0_i32_0 = arith.constant 0 : i32
    return %arg0, %c0_i32 : i32, i32
  }
  func.func @transform_1(%arg0: i32, %arg1: i32) -> (i32, i32) {
    %c0_i32 = arith.constant 0 : i32
    %c0_i32_0 = arith.constant 0 : i32
    return %c0_i32, %arg1 : i32, i32
  }
  func.func @transform_2(%arg0: i32, %arg1: i32) -> (i32, i32) {
    %c0_i32 = arith.constant 0 : i32
    %c0_i32_0 = arith.constant 0 : i32
    return %c0_i32, %arg1 : i32, i32
  }
  func.func @transform_3(%arg0: i32, %arg1: i32) -> (i32, i32) {
    %c0_i32 = arith.constant 0 : i32
    return %arg0, %arg1 : i32, i32
  }
}

module attributes {stable_mosaic.version = 11 : i64} {
  func.func @_lstm_layer_kernel(%arg0: i32, %arg1: memref<128x128xbf16, #tpu.memory_space<vmem>>, %arg2: memref<128x512xbf16, #tpu.memory_space<vmem>>, %arg3: memref<128x512xbf16, #tpu.memory_space<vmem>>, %arg4: memref<1x512xf32, #tpu.memory_space<vmem>>, %arg5: memref<128x128xbf16, #tpu.memory_space<vmem>>, %arg6: memref<16x128xbf16, #tpu.memory_space<vmem>>, %arg7: memref<16x128xf32, #tpu.memory_space<vmem>>, %arg8: memref<128x512xbf16, #tpu.memory_space<vmem>>) attributes {dimension_semantics = [#tpu.dimension_semantics<arbitrary>], iteration_bounds = array<i64: 1>, scalar_prefetch = 0 : i64, scratch_operands = 3 : i64, tpu.core_type = #tpu.core_type<tc>, window_params = [{transform_indices = @transform_0, window_bounds = array<i64: 128, 128>}, {pipeline_mode = #tpu.pipeline_mode<synchronous>, transform_indices = @transform_1, window_bounds = array<i64: 128, 512>}, {pipeline_mode = #tpu.pipeline_mode<synchronous>, transform_indices = @transform_2, window_bounds = array<i64: 128, 512>}, {pipeline_mode = #tpu.pipeline_mode<synchronous>, transform_indices = @transform_3, window_bounds = array<i64: 1, 512>}, {transform_indices = @transform_4, window_bounds = array<i64: 128, 128>}]} {
    %c0_i32 = arith.constant 0 : i32
    %0 = arith.cmpi eq, %arg0, %c0_i32 : i32
    %1 = arith.extui %0 : i1 to i32
    %c0_i32_0 = arith.constant 0 : i32
    %2 = arith.cmpi ne, %1, %c0_i32_0 : i32
    scf.if %2 {
      %cst_72 = arith.constant 0.000000e+00 : bf16
      %231 = vector.broadcast %cst_72 : bf16 to vector<16x128xbf16>
      %c0_73 = arith.constant 0 : index
      %c0_74 = arith.constant 0 : index
      %232 = vector.load %arg6[%c0_73, %c0_74] : memref<16x128xbf16, #tpu.memory_space<vmem>>, vector<16x128xbf16>
      tpu.vector_store %arg6[%c0_73, %c0_74], %231 {strides = array<i32>} : memref<16x128xbf16, #tpu.memory_space<vmem>>, vector<16x128xbf16>,
      %cst_75 = arith.constant 0.000000e+00 : f32
      %233 = vector.broadcast %cst_75 : f32 to vector<16x128xf32>
      %c0_76 = arith.constant 0 : index
      %c0_77 = arith.constant 0 : index
      %234 = vector.load %arg7[%c0_76, %c0_77] : memref<16x128xf32, #tpu.memory_space<vmem>>, vector<16x128xf32>
      tpu.vector_store %arg7[%c0_76, %c0_77], %233 {strides = array<i32>} : memref<16x128xf32, #tpu.memory_space<vmem>>, vector<16x128xf32>,
    } else {
    }
    %c0 = arith.constant 0 : index
    %c0_1 = arith.constant 0 : index
    %3 = vector.load %arg1[%c0, %c0_1] : memref<128x128xbf16, #tpu.memory_space<vmem>>, vector<128x128xbf16>
    %c0_2 = arith.constant 0 : index
    %c0_3 = arith.constant 0 : index
    %4 = vector.load %arg2[%c0_2, %c0_3] : memref<128x512xbf16, #tpu.memory_space<vmem>>, vector<128x512xbf16>
    %cst = arith.constant dense<0.000000e+00> : vector<128x512xf32>
    %5 = tpu.matmul %3, %4, %cst {dimension_numbers = #tpu.dot_dimension_numbers<[1], [0], [0], [1], [0, 0, 1, 1], [], []>} : vector<128x128xbf16>, vector<128x512xbf16>, vector<128x512xf32> -> vector<128x512xf32>
    %c0_4 = arith.constant 0 : index
    %c0_5 = arith.constant 0 : index
    %6 = vector.load %arg4[%c0_4, %c0_5] : memref<1x512xf32, #tpu.memory_space<vmem>>, vector<1x512xf32>
    %7 = vector.broadcast %6 : vector<1x512xf32> to vector<128x512xf32>
    %8 = arith.addf %5, %7 : vector<128x512xf32>
    %9 = arith.truncf %8 : vector<128x512xf32> to vector<128x512xbf16>
    %c0_6 = arith.constant 0 : index
    %c0_7 = arith.constant 0 : index
    %10 = vector.load %arg8[%c0_6, %c0_7] : memref<128x512xbf16, #tpu.memory_space<vmem>>, vector<128x512xbf16>
    tpu.vector_store %arg8[%c0_6, %c0_7], %9 {strides = array<i32>} : memref<128x512xbf16, #tpu.memory_space<vmem>>, vector<128x512xbf16>,
    %c0_8 = arith.constant 0 : index
    %c0_9 = arith.constant 0 : index
    %11 = vector.load %arg6[%c0_8, %c0_9] : memref<16x128xbf16, #tpu.memory_space<vmem>>, vector<16x128xbf16>
    %c0_10 = arith.constant 0 : index
    %c0_11 = arith.constant 0 : index
    %12 = vector.load %arg7[%c0_10, %c0_11] : memref<16x128xf32, #tpu.memory_space<vmem>>, vector<16x128xf32>
    %c0_i32_12 = arith.constant 0 : i32
    %c16_i32 = arith.constant 16 : i32
    %13 = arith.muli %c0_i32_12, %c16_i32 : i32
    %14 = tpu.assume_multiple %13, 16 : i32
    %15 = arith.index_cast %14 : i32 to index
    %c0_13 = arith.constant 0 : index
    %16 = vector.load %arg8[%15, %c0_13] : memref<128x512xbf16, #tpu.memory_space<vmem>>, vector<16x512xbf16>
    %c0_14 = arith.constant 0 : index
    %c0_15 = arith.constant 0 : index
    %17 = vector.load %arg3[%c0_14, %c0_15] : memref<128x512xbf16, #tpu.memory_space<vmem>>, vector<128x512xbf16>
    %cst_16 = arith.constant dense<0.000000e+00> : vector<16x512xf32>
    %18 = tpu.matmul %11, %17, %cst_16 {dimension_numbers = #tpu.dot_dimension_numbers<[1], [0], [0], [1], [0, 0, 1, 1], [], []>} : vector<16x128xbf16>, vector<128x512xbf16>, vector<16x512xf32> -> vector<16x512xf32>
    %19 = arith.extf %16 : vector<16x512xbf16> to vector<16x512xf32>
    %20 = arith.addf %19, %18 : vector<16x512xf32>
    %21 = vector.extract_strided_slice %20 {offsets = [0, 0], sizes = [16, 384], strides = [1, 1]} : vector<16x512xf32> to vector<16x384xf32>
    %22 = arith.negf %21 : vector<16x384xf32>
    %23 = math.exp %22 : vector<16x384xf32>
    %cst_17 = arith.constant 1.000000e+00 : f32
    %24 = vector.broadcast %cst_17 : f32 to vector<16x384xf32>
    %25 = arith.addf %24, %23 : vector<16x384xf32>
    %26 = arith.divf %24, %25 : vector<16x384xf32>
    %27 = vector.extract_strided_slice %26 {offsets = [0, 0], sizes = [16, 128], strides = [1, 1]} : vector<16x384xf32> to vector<16x128xf32>
    %28 = vector.extract_strided_slice %26 {offsets = [0, 128], sizes = [16, 128], strides = [1, 1]} : vector<16x384xf32> to vector<16x128xf32>
    %29 = vector.extract_strided_slice %26 {offsets = [0, 256], sizes = [16, 128], strides = [1, 1]} : vector<16x384xf32> to vector<16x128xf32>
    %30 = vector.extract_strided_slice %20 {offsets = [0, 384], sizes = [16, 128], strides = [1, 1]} : vector<16x512xf32> to vector<16x128xf32>
    %31 = math.tanh %30 : vector<16x128xf32>
    %32 = arith.mulf %28, %12 : vector<16x128xf32>
    %33 = arith.mulf %27, %31 : vector<16x128xf32>
    %34 = arith.addf %32, %33 : vector<16x128xf32>
    %35 = math.tanh %34 : vector<16x128xf32>
    %36 = arith.mulf %29, %35 : vector<16x128xf32>
    %37 = arith.truncf %36 : vector<16x128xf32> to vector<16x128xbf16>
    %38 = arith.index_cast %14 : i32 to index
    %c0_18 = arith.constant 0 : index
    %39 = vector.load %arg5[%38, %c0_18] : memref<128x128xbf16, #tpu.memory_space<vmem>>, vector<16x128xbf16>
    tpu.vector_store %arg5[%38, %c0_18], %37 {strides = array<i32>} : memref<128x128xbf16, #tpu.memory_space<vmem>>, vector<16x128xbf16>,
    %c1_i32 = arith.constant 1 : i32
    %c16_i32_19 = arith.constant 16 : i32
    %40 = arith.muli %c1_i32, %c16_i32_19 : i32
    %41 = tpu.assume_multiple %40, 16 : i32
    %42 = arith.index_cast %41 : i32 to index
    %c0_20 = arith.constant 0 : index
    %43 = vector.load %arg8[%42, %c0_20] : memref<128x512xbf16, #tpu.memory_space<vmem>>, vector<16x512xbf16>
    %c0_21 = arith.constant 0 : index
    %c0_22 = arith.constant 0 : index
    %44 = vector.load %arg3[%c0_21, %c0_22] : memref<128x512xbf16, #tpu.memory_space<vmem>>, vector<128x512xbf16>
    %cst_23 = arith.constant dense<0.000000e+00> : vector<16x512xf32>
    %45 = tpu.matmul %37, %44, %cst_23 {dimension_numbers = #tpu.dot_dimension_numbers<[1], [0], [0], [1], [0, 0, 1, 1], [], []>} : vector<16x128xbf16>, vector<128x512xbf16>, vector<16x512xf32> -> vector<16x512xf32>
    %46 = arith.extf %43 : vector<16x512xbf16> to vector<16x512xf32>
    %47 = arith.addf %46, %45 : vector<16x512xf32>
    %48 = vector.extract_strided_slice %47 {offsets = [0, 0], sizes = [16, 384], strides = [1, 1]} : vector<16x512xf32> to vector<16x384xf32>
    %49 = arith.negf %48 : vector<16x384xf32>
    %50 = math.exp %49 : vector<16x384xf32>
    %cst_24 = arith.constant 1.000000e+00 : f32
    %51 = vector.broadcast %cst_24 : f32 to vector<16x384xf32>
    %52 = arith.addf %51, %50 : vector<16x384xf32>
    %53 = arith.divf %51, %52 : vector<16x384xf32>
    %54 = vector.extract_strided_slice %53 {offsets = [0, 0], sizes = [16, 128], strides = [1, 1]} : vector<16x384xf32> to vector<16x128xf32>
    %55 = vector.extract_strided_slice %53 {offsets = [0, 128], sizes = [16, 128], strides = [1, 1]} : vector<16x384xf32> to vector<16x128xf32>
    %56 = vector.extract_strided_slice %53 {offsets = [0, 256], sizes = [16, 128], strides = [1, 1]} : vector<16x384xf32> to vector<16x128xf32>
    %57 = vector.extract_strided_slice %47 {offsets = [0, 384], sizes = [16, 128], strides = [1, 1]} : vector<16x512xf32> to vector<16x128xf32>
    %58 = math.tanh %57 : vector<16x128xf32>
    %59 = arith.mulf %55, %34 : vector<16x128xf32>
    %60 = arith.mulf %54, %58 : vector<16x128xf32>
    %61 = arith.addf %59, %60 : vector<16x128xf32>
    %62 = math.tanh %61 : vector<16x128xf32>
    %63 = arith.mulf %56, %62 : vector<16x128xf32>
    %64 = arith.truncf %63 : vector<16x128xf32> to vector<16x128xbf16>
    %65 = arith.index_cast %41 : i32 to index
    %c0_25 = arith.constant 0 : index
    %66 = vector.load %arg5[%65, %c0_25] : memref<128x128xbf16, #tpu.memory_space<vmem>>, vector<16x128xbf16>
    tpu.vector_store %arg5[%65, %c0_25], %64 {strides = array<i32>} : memref<128x128xbf16, #tpu.memory_space<vmem>>, vector<16x128xbf16>,
    %c2_i32 = arith.constant 2 : i32
    %c16_i32_26 = arith.constant 16 : i32
    %67 = arith.muli %c2_i32, %c16_i32_26 : i32
    %68 = tpu.assume_multiple %67, 16 : i32
    %69 = arith.index_cast %68 : i32 to index
    %c0_27 = arith.constant 0 : index
    %70 = vector.load %arg8[%69, %c0_27] : memref<128x512xbf16, #tpu.memory_space<vmem>>, vector<16x512xbf16>
    %c0_28 = arith.constant 0 : index
    %c0_29 = arith.constant 0 : index
    %71 = vector.load %arg3[%c0_28, %c0_29] : memref<128x512xbf16, #tpu.memory_space<vmem>>, vector<128x512xbf16>
    %cst_30 = arith.constant dense<0.000000e+00> : vector<16x512xf32>
    %72 = tpu.matmul %64, %71, %cst_30 {dimension_numbers = #tpu.dot_dimension_numbers<[1], [0], [0], [1], [0, 0, 1, 1], [], []>} : vector<16x128xbf16>, vector<128x512xbf16>, vector<16x512xf32> -> vector<16x512xf32>
    %73 = arith.extf %70 : vector<16x512xbf16> to vector<16x512xf32>
    %74 = arith.addf %73, %72 : vector<16x512xf32>
    %75 = vector.extract_strided_slice %74 {offsets = [0, 0], sizes = [16, 384], strides = [1, 1]} : vector<16x512xf32> to vector<16x384xf32>
    %76 = arith.negf %75 : vector<16x384xf32>
    %77 = math.exp %76 : vector<16x384xf32>
    %cst_31 = arith.constant 1.000000e+00 : f32
    %78 = vector.broadcast %cst_31 : f32 to vector<16x384xf32>
    %79 = arith.addf %78, %77 : vector<16x384xf32>
    %80 = arith.divf %78, %79 : vector<16x384xf32>
    %81 = vector.extract_strided_slice %80 {offsets = [0, 0], sizes = [16, 128], strides = [1, 1]} : vector<16x384xf32> to vector<16x128xf32>
    %82 = vector.extract_strided_slice %80 {offsets = [0, 128], sizes = [16, 128], strides = [1, 1]} : vector<16x384xf32> to vector<16x128xf32>
    %83 = vector.extract_strided_slice %80 {offsets = [0, 256], sizes = [16, 128], strides = [1, 1]} : vector<16x384xf32> to vector<16x128xf32>
    %84 = vector.extract_strided_slice %74 {offsets = [0, 384], sizes = [16, 128], strides = [1, 1]} : vector<16x512xf32> to vector<16x128xf32>
    %85 = math.tanh %84 : vector<16x128xf32>
    %86 = arith.mulf %82, %61 : vector<16x128xf32>
    %87 = arith.mulf %81, %85 : vector<16x128xf32>
    %88 = arith.addf %86, %87 : vector<16x128xf32>
    %89 = math.tanh %88 : vector<16x128xf32>
    %90 = arith.mulf %83, %89 : vector<16x128xf32>
    %91 = arith.truncf %90 : vector<16x128xf32> to vector<16x128xbf16>
    %92 = arith.index_cast %68 : i32 to index
    %c0_32 = arith.constant 0 : index
    %93 = vector.load %arg5[%92, %c0_32] : memref<128x128xbf16, #tpu.memory_space<vmem>>, vector<16x128xbf16>
    tpu.vector_store %arg5[%92, %c0_32], %91 {strides = array<i32>} : memref<128x128xbf16, #tpu.memory_space<vmem>>, vector<16x128xbf16>,
    %c3_i32 = arith.constant 3 : i32
    %c16_i32_33 = arith.constant 16 : i32
    %94 = arith.muli %c3_i32, %c16_i32_33 : i32
    %95 = tpu.assume_multiple %94, 16 : i32
    %96 = arith.index_cast %95 : i32 to index
    %c0_34 = arith.constant 0 : index
    %97 = vector.load %arg8[%96, %c0_34] : memref<128x512xbf16, #tpu.memory_space<vmem>>, vector<16x512xbf16>
    %c0_35 = arith.constant 0 : index
    %c0_36 = arith.constant 0 : index
    %98 = vector.load %arg3[%c0_35, %c0_36] : memref<128x512xbf16, #tpu.memory_space<vmem>>, vector<128x512xbf16>
    %cst_37 = arith.constant dense<0.000000e+00> : vector<16x512xf32>
    %99 = tpu.matmul %91, %98, %cst_37 {dimension_numbers = #tpu.dot_dimension_numbers<[1], [0], [0], [1], [0, 0, 1, 1], [], []>} : vector<16x128xbf16>, vector<128x512xbf16>, vector<16x512xf32> -> vector<16x512xf32>
    %100 = arith.extf %97 : vector<16x512xbf16> to vector<16x512xf32>
    %101 = arith.addf %100, %99 : vector<16x512xf32>
    %102 = vector.extract_strided_slice %101 {offsets = [0, 0], sizes = [16, 384], strides = [1, 1]} : vector<16x512xf32> to vector<16x384xf32>
    %103 = arith.negf %102 : vector<16x384xf32>
    %104 = math.exp %103 : vector<16x384xf32>
    %cst_38 = arith.constant 1.000000e+00 : f32
    %105 = vector.broadcast %cst_38 : f32 to vector<16x384xf32>
    %106 = arith.addf %105, %104 : vector<16x384xf32>
    %107 = arith.divf %105, %106 : vector<16x384xf32>
    %108 = vector.extract_strided_slice %107 {offsets = [0, 0], sizes = [16, 128], strides = [1, 1]} : vector<16x384xf32> to vector<16x128xf32>
    %109 = vector.extract_strided_slice %107 {offsets = [0, 128], sizes = [16, 128], strides = [1, 1]} : vector<16x384xf32> to vector<16x128xf32>
    %110 = vector.extract_strided_slice %107 {offsets = [0, 256], sizes = [16, 128], strides = [1, 1]} : vector<16x384xf32> to vector<16x128xf32>
    %111 = vector.extract_strided_slice %101 {offsets = [0, 384], sizes = [16, 128], strides = [1, 1]} : vector<16x512xf32> to vector<16x128xf32>
    %112 = math.tanh %111 : vector<16x128xf32>
    %113 = arith.mulf %109, %88 : vector<16x128xf32>
    %114 = arith.mulf %108, %112 : vector<16x128xf32>
    %115 = arith.addf %113, %114 : vector<16x128xf32>
    %116 = math.tanh %115 : vector<16x128xf32>
    %117 = arith.mulf %110, %116 : vector<16x128xf32>
    %118 = arith.truncf %117 : vector<16x128xf32> to vector<16x128xbf16>
    %119 = arith.index_cast %95 : i32 to index
    %c0_39 = arith.constant 0 : index
    %120 = vector.load %arg5[%119, %c0_39] : memref<128x128xbf16, #tpu.memory_space<vmem>>, vector<16x128xbf16>
    tpu.vector_store %arg5[%119, %c0_39], %118 {strides = array<i32>} : memref<128x128xbf16, #tpu.memory_space<vmem>>, vector<16x128xbf16>,
    %c4_i32 = arith.constant 4 : i32
    %c16_i32_40 = arith.constant 16 : i32
    %121 = arith.muli %c4_i32, %c16_i32_40 : i32
    %122 = tpu.assume_multiple %121, 16 : i32
    %123 = arith.index_cast %122 : i32 to index
    %c0_41 = arith.constant 0 : index
    %124 = vector.load %arg8[%123, %c0_41] : memref<128x512xbf16, #tpu.memory_space<vmem>>, vector<16x512xbf16>
    %c0_42 = arith.constant 0 : index
    %c0_43 = arith.constant 0 : index
    %125 = vector.load %arg3[%c0_42, %c0_43] : memref<128x512xbf16, #tpu.memory_space<vmem>>, vector<128x512xbf16>
    %cst_44 = arith.constant dense<0.000000e+00> : vector<16x512xf32>
    %126 = tpu.matmul %118, %125, %cst_44 {dimension_numbers = #tpu.dot_dimension_numbers<[1], [0], [0], [1], [0, 0, 1, 1], [], []>} : vector<16x128xbf16>, vector<128x512xbf16>, vector<16x512xf32> -> vector<16x512xf32>
    %127 = arith.extf %124 : vector<16x512xbf16> to vector<16x512xf32>
    %128 = arith.addf %127, %126 : vector<16x512xf32>
    %129 = vector.extract_strided_slice %128 {offsets = [0, 0], sizes = [16, 384], strides = [1, 1]} : vector<16x512xf32> to vector<16x384xf32>
    %130 = arith.negf %129 : vector<16x384xf32>
    %131 = math.exp %130 : vector<16x384xf32>
    %cst_45 = arith.constant 1.000000e+00 : f32
    %132 = vector.broadcast %cst_45 : f32 to vector<16x384xf32>
    %133 = arith.addf %132, %131 : vector<16x384xf32>
    %134 = arith.divf %132, %133 : vector<16x384xf32>
    %135 = vector.extract_strided_slice %134 {offsets = [0, 0], sizes = [16, 128], strides = [1, 1]} : vector<16x384xf32> to vector<16x128xf32>
    %136 = vector.extract_strided_slice %134 {offsets = [0, 128], sizes = [16, 128], strides = [1, 1]} : vector<16x384xf32> to vector<16x128xf32>
    %137 = vector.extract_strided_slice %134 {offsets = [0, 256], sizes = [16, 128], strides = [1, 1]} : vector<16x384xf32> to vector<16x128xf32>
    %138 = vector.extract_strided_slice %128 {offsets = [0, 384], sizes = [16, 128], strides = [1, 1]} : vector<16x512xf32> to vector<16x128xf32>
    %139 = math.tanh %138 : vector<16x128xf32>
    %140 = arith.mulf %136, %115 : vector<16x128xf32>
    %141 = arith.mulf %135, %139 : vector<16x128xf32>
    %142 = arith.addf %140, %141 : vector<16x128xf32>
    %143 = math.tanh %142 : vector<16x128xf32>
    %144 = arith.mulf %137, %143 : vector<16x128xf32>
    %145 = arith.truncf %144 : vector<16x128xf32> to vector<16x128xbf16>
    %146 = arith.index_cast %122 : i32 to index
    %c0_46 = arith.constant 0 : index
    %147 = vector.load %arg5[%146, %c0_46] : memref<128x128xbf16, #tpu.memory_space<vmem>>, vector<16x128xbf16>
    tpu.vector_store %arg5[%146, %c0_46], %145 {strides = array<i32>} : memref<128x128xbf16, #tpu.memory_space<vmem>>, vector<16x128xbf16>,
    %c5_i32 = arith.constant 5 : i32
    %c16_i32_47 = arith.constant 16 : i32
    %148 = arith.muli %c5_i32, %c16_i32_47 : i32
    %149 = tpu.assume_multiple %148, 16 : i32
    %150 = arith.index_cast %149 : i32 to index
    %c0_48 = arith.constant 0 : index
    %151 = vector.load %arg8[%150, %c0_48] : memref<128x512xbf16, #tpu.memory_space<vmem>>, vector<16x512xbf16>
    %c0_49 = arith.constant 0 : index
    %c0_50 = arith.constant 0 : index
    %152 = vector.load %arg3[%c0_49, %c0_50] : memref<128x512xbf16, #tpu.memory_space<vmem>>, vector<128x512xbf16>
    %cst_51 = arith.constant dense<0.000000e+00> : vector<16x512xf32>
    %153 = tpu.matmul %145, %152, %cst_51 {dimension_numbers = #tpu.dot_dimension_numbers<[1], [0], [0], [1], [0, 0, 1, 1], [], []>} : vector<16x128xbf16>, vector<128x512xbf16>, vector<16x512xf32> -> vector<16x512xf32>
    %154 = arith.extf %151 : vector<16x512xbf16> to vector<16x512xf32>
    %155 = arith.addf %154, %153 : vector<16x512xf32>
    %156 = vector.extract_strided_slice %155 {offsets = [0, 0], sizes = [16, 384], strides = [1, 1]} : vector<16x512xf32> to vector<16x384xf32>
    %157 = arith.negf %156 : vector<16x384xf32>
    %158 = math.exp %157 : vector<16x384xf32>
    %cst_52 = arith.constant 1.000000e+00 : f32
    %159 = vector.broadcast %cst_52 : f32 to vector<16x384xf32>
    %160 = arith.addf %159, %158 : vector<16x384xf32>
    %161 = arith.divf %159, %160 : vector<16x384xf32>
    %162 = vector.extract_strided_slice %161 {offsets = [0, 0], sizes = [16, 128], strides = [1, 1]} : vector<16x384xf32> to vector<16x128xf32>
    %163 = vector.extract_strided_slice %161 {offsets = [0, 128], sizes = [16, 128], strides = [1, 1]} : vector<16x384xf32> to vector<16x128xf32>
    %164 = vector.extract_strided_slice %161 {offsets = [0, 256], sizes = [16, 128], strides = [1, 1]} : vector<16x384xf32> to vector<16x128xf32>
    %165 = vector.extract_strided_slice %155 {offsets = [0, 384], sizes = [16, 128], strides = [1, 1]} : vector<16x512xf32> to vector<16x128xf32>
    %166 = math.tanh %165 : vector<16x128xf32>
    %167 = arith.mulf %163, %142 : vector<16x128xf32>
    %168 = arith.mulf %162, %166 : vector<16x128xf32>
    %169 = arith.addf %167, %168 : vector<16x128xf32>
    %170 = math.tanh %169 : vector<16x128xf32>
    %171 = arith.mulf %164, %170 : vector<16x128xf32>
    %172 = arith.truncf %171 : vector<16x128xf32> to vector<16x128xbf16>
    %173 = arith.index_cast %149 : i32 to index
    %c0_53 = arith.constant 0 : index
    %174 = vector.load %arg5[%173, %c0_53] : memref<128x128xbf16, #tpu.memory_space<vmem>>, vector<16x128xbf16>
    tpu.vector_store %arg5[%173, %c0_53], %172 {strides = array<i32>} : memref<128x128xbf16, #tpu.memory_space<vmem>>, vector<16x128xbf16>,
    %c6_i32 = arith.constant 6 : i32
    %c16_i32_54 = arith.constant 16 : i32
    %175 = arith.muli %c6_i32, %c16_i32_54 : i32
    %176 = tpu.assume_multiple %175, 16 : i32
    %177 = arith.index_cast %176 : i32 to index
    %c0_55 = arith.constant 0 : index
    %178 = vector.load %arg8[%177, %c0_55] : memref<128x512xbf16, #tpu.memory_space<vmem>>, vector<16x512xbf16>
    %c0_56 = arith.constant 0 : index
    %c0_57 = arith.constant 0 : index
    %179 = vector.load %arg3[%c0_56, %c0_57] : memref<128x512xbf16, #tpu.memory_space<vmem>>, vector<128x512xbf16>
    %cst_58 = arith.constant dense<0.000000e+00> : vector<16x512xf32>
    %180 = tpu.matmul %172, %179, %cst_58 {dimension_numbers = #tpu.dot_dimension_numbers<[1], [0], [0], [1], [0, 0, 1, 1], [], []>} : vector<16x128xbf16>, vector<128x512xbf16>, vector<16x512xf32> -> vector<16x512xf32>
    %181 = arith.extf %178 : vector<16x512xbf16> to vector<16x512xf32>
    %182 = arith.addf %181, %180 : vector<16x512xf32>
    %183 = vector.extract_strided_slice %182 {offsets = [0, 0], sizes = [16, 384], strides = [1, 1]} : vector<16x512xf32> to vector<16x384xf32>
    %184 = arith.negf %183 : vector<16x384xf32>
    %185 = math.exp %184 : vector<16x384xf32>
    %cst_59 = arith.constant 1.000000e+00 : f32
    %186 = vector.broadcast %cst_59 : f32 to vector<16x384xf32>
    %187 = arith.addf %186, %185 : vector<16x384xf32>
    %188 = arith.divf %186, %187 : vector<16x384xf32>
    %189 = vector.extract_strided_slice %188 {offsets = [0, 0], sizes = [16, 128], strides = [1, 1]} : vector<16x384xf32> to vector<16x128xf32>
    %190 = vector.extract_strided_slice %188 {offsets = [0, 128], sizes = [16, 128], strides = [1, 1]} : vector<16x384xf32> to vector<16x128xf32>
    %191 = vector.extract_strided_slice %188 {offsets = [0, 256], sizes = [16, 128], strides = [1, 1]} : vector<16x384xf32> to vector<16x128xf32>
    %192 = vector.extract_strided_slice %182 {offsets = [0, 384], sizes = [16, 128], strides = [1, 1]} : vector<16x512xf32> to vector<16x128xf32>
    %193 = math.tanh %192 : vector<16x128xf32>
    %194 = arith.mulf %190, %169 : vector<16x128xf32>
    %195 = arith.mulf %189, %193 : vector<16x128xf32>
    %196 = arith.addf %194, %195 : vector<16x128xf32>
    %197 = math.tanh %196 : vector<16x128xf32>
    %198 = arith.mulf %191, %197 : vector<16x128xf32>
    %199 = arith.truncf %198 : vector<16x128xf32> to vector<16x128xbf16>
    %200 = arith.index_cast %176 : i32 to index
    %c0_60 = arith.constant 0 : index
    %201 = vector.load %arg5[%200, %c0_60] : memref<128x128xbf16, #tpu.memory_space<vmem>>, vector<16x128xbf16>
    tpu.vector_store %arg5[%200, %c0_60], %199 {strides = array<i32>} : memref<128x128xbf16, #tpu.memory_space<vmem>>, vector<16x128xbf16>,
    %c7_i32 = arith.constant 7 : i32
    %c16_i32_61 = arith.constant 16 : i32
    %202 = arith.muli %c7_i32, %c16_i32_61 : i32
    %203 = tpu.assume_multiple %202, 16 : i32
    %204 = arith.index_cast %203 : i32 to index
    %c0_62 = arith.constant 0 : index
    %205 = vector.load %arg8[%204, %c0_62] : memref<128x512xbf16, #tpu.memory_space<vmem>>, vector<16x512xbf16>
    %c0_63 = arith.constant 0 : index
    %c0_64 = arith.constant 0 : index
    %206 = vector.load %arg3[%c0_63, %c0_64] : memref<128x512xbf16, #tpu.memory_space<vmem>>, vector<128x512xbf16>
    %cst_65 = arith.constant dense<0.000000e+00> : vector<16x512xf32>
    %207 = tpu.matmul %199, %206, %cst_65 {dimension_numbers = #tpu.dot_dimension_numbers<[1], [0], [0], [1], [0, 0, 1, 1], [], []>} : vector<16x128xbf16>, vector<128x512xbf16>, vector<16x512xf32> -> vector<16x512xf32>
    %208 = arith.extf %205 : vector<16x512xbf16> to vector<16x512xf32>
    %209 = arith.addf %208, %207 : vector<16x512xf32>
    %210 = vector.extract_strided_slice %209 {offsets = [0, 0], sizes = [16, 384], strides = [1, 1]} : vector<16x512xf32> to vector<16x384xf32>
    %211 = arith.negf %210 : vector<16x384xf32>
    %212 = math.exp %211 : vector<16x384xf32>
    %cst_66 = arith.constant 1.000000e+00 : f32
    %213 = vector.broadcast %cst_66 : f32 to vector<16x384xf32>
    %214 = arith.addf %213, %212 : vector<16x384xf32>
    %215 = arith.divf %213, %214 : vector<16x384xf32>
    %216 = vector.extract_strided_slice %215 {offsets = [0, 0], sizes = [16, 128], strides = [1, 1]} : vector<16x384xf32> to vector<16x128xf32>
    %217 = vector.extract_strided_slice %215 {offsets = [0, 128], sizes = [16, 128], strides = [1, 1]} : vector<16x384xf32> to vector<16x128xf32>
    %218 = vector.extract_strided_slice %215 {offsets = [0, 256], sizes = [16, 128], strides = [1, 1]} : vector<16x384xf32> to vector<16x128xf32>
    %219 = vector.extract_strided_slice %209 {offsets = [0, 384], sizes = [16, 128], strides = [1, 1]} : vector<16x512xf32> to vector<16x128xf32>
    %220 = math.tanh %219 : vector<16x128xf32>
    %221 = arith.mulf %217, %196 : vector<16x128xf32>
    %222 = arith.mulf %216, %220 : vector<16x128xf32>
    %223 = arith.addf %221, %222 : vector<16x128xf32>
    %224 = math.tanh %223 : vector<16x128xf32>
    %225 = arith.mulf %218, %224 : vector<16x128xf32>
    %226 = arith.truncf %225 : vector<16x128xf32> to vector<16x128xbf16>
    %227 = arith.index_cast %203 : i32 to index
    %c0_67 = arith.constant 0 : index
    %228 = vector.load %arg5[%227, %c0_67] : memref<128x128xbf16, #tpu.memory_space<vmem>>, vector<16x128xbf16>
    tpu.vector_store %arg5[%227, %c0_67], %226 {strides = array<i32>} : memref<128x128xbf16, #tpu.memory_space<vmem>>, vector<16x128xbf16>,
    %c8_i32 = arith.constant 8 : i32
    %c0_68 = arith.constant 0 : index
    %c0_69 = arith.constant 0 : index
    %229 = vector.load %arg6[%c0_68, %c0_69] : memref<16x128xbf16, #tpu.memory_space<vmem>>, vector<16x128xbf16>
    tpu.vector_store %arg6[%c0_68, %c0_69], %226 {strides = array<i32>} : memref<16x128xbf16, #tpu.memory_space<vmem>>, vector<16x128xbf16>,
    %c0_70 = arith.constant 0 : index
    %c0_71 = arith.constant 0 : index
    %230 = vector.load %arg7[%c0_70, %c0_71] : memref<16x128xf32, #tpu.memory_space<vmem>>, vector<16x128xf32>
    tpu.vector_store %arg7[%c0_70, %c0_71], %223 {strides = array<i32>} : memref<16x128xf32, #tpu.memory_space<vmem>>, vector<16x128xf32>,
    return
  }
  func.func @transform_0(%arg0: i32) -> (i32, i32) {
    %c0_i32 = arith.constant 0 : i32
    %c0_i32_0 = arith.constant 0 : i32
    return %arg0, %c0_i32 : i32, i32
  }
  func.func @transform_1(%arg0: i32) -> (i32, i32) {
    %c0_i32 = arith.constant 0 : i32
    %c0_i32_0 = arith.constant 0 : i32
    %c0_i32_1 = arith.constant 0 : i32
    return %c0_i32, %c0_i32_0 : i32, i32
  }
  func.func @transform_2(%arg0: i32) -> (i32, i32) {
    %c0_i32 = arith.constant 0 : i32
    %c0_i32_0 = arith.constant 0 : i32
    %c0_i32_1 = arith.constant 0 : i32
    return %c0_i32, %c0_i32_0 : i32, i32
  }
  func.func @transform_3(%arg0: i32) -> (i32, i32) {
    %c0_i32 = arith.constant 0 : i32
    %c0_i32_0 = arith.constant 0 : i32
    %c0_i32_1 = arith.constant 0 : i32
    return %c0_i32, %c0_i32_0 : i32, i32
  }
  func.func @transform_4(%arg0: i32) -> (i32, i32) {
    %c0_i32 = arith.constant 0 : i32
    %c0_i32_0 = arith.constant 0 : i32
    return %arg0, %c0_i32 : i32, i32
  }
}

</mosaic_0001>

<bundles_post_ra>
// kernel: my_lstm_forward.5
= control target key start
LH: loop header
LB: loop body
LE: loop exit
PB: predicated region body
PF: predicated region fallthrough
CT: control target
= control target key end

     0   :  { %8 = vsyncpa [#allocation3], 0  ;;  %s432_s0 = inlined_call_operand.hbm [shape: bf16[16,128], index: 0, kind: input, shape index: {}]   ;;  %s433_s1 = inlined_call_operand.hbm [shape: bf16[128,128], index: 1, kind: input, shape index: {}]   ;;  %s434_s2 = inlined_call_operand.hbm [shape: f32[1,128], index: 2, kind: input, shape index: {}]   ;;  %s435_s3 = inlined_call_operand.hbm [shape: f32[16,128], index: 3, kind: output, shape index: {}]  }
   0x1   :  { %9 = vsyncpa [#allocation6], 0 }
   0x2   :  { %10 = vsyncpa [#allocation4], 0  ;;  %s347_s12 = smov [#allocation5]   ;;  %s348_s14 = smov [#allocation2]  }
   0x3   :  { %s28_s13 = sshll.u32 %s347_s12, 4  ;;  %s16_s15 = sshll.u32 %s348_s14, 4  ;;  %s29_s13 = int_to_ptr.vmem [resolvable:$true] %s28_s13  ;;  %s377_s15 = int_to_ptr.vmem [resolvable:$true] %s16_s15 }
   0x4   :  { %s253_s18 = scalar_lea.hbm %s433_s1, 1024 }
   0x5   :  { %p254_p0 = scmp.ne.s32.totalorder %s433_s1, %s253_s18  ;;  %p257_p1 = scmp.lt.u32.totalorder %s253_s18, %s433_s1 }
   0x7   :  { %p259_p2 = pnand %p257_p1, %p254_p0 }
   0x9   :  { %262 = shalt.err (!%p259_p2)
}
   0xa   :  { %s263_s23 = scalar_lea.vmem %s29_s13, 1024  ;;  %p268_p4 = scmp.lt.s32.totalorder %s29_s13, %s29_s13 }
   0xb   :  { %p264_p3 = scmp.ne.s32.totalorder %s29_s13, %s263_s23  ;;  %p269_p5 = scmp.lt.s32.totalorder %s263_s23, %s263_s23 }
   0xd   :  { %p270_p6 = por %p269_p5, %p268_p4 }
   0xf   :  { %p271_p7 = pnand %p270_p6, %p264_p3 }
  0x11   :  { %274 = shalt.err (!%p271_p7)
}
  0x12   :  { %s349_s24 = smov 64   ;;  %s350_s25 = smov 4  }
  0x13   :  { %34 = dma.hbm_to_vmem [thread:$0]  %s433_s1, 1024, %s29_s13, [#allocation6], %s349_s24, %s349_s24, %s350_s25  }
  0x14   :  { %s275_s30 = scalar_lea.hbm %s432_s0, 128 }
  0x15   :  { %p276_p8 = scmp.ne.s32.totalorder %s432_s0, %s275_s30  ;;  %p279_p9 = scmp.lt.u32.totalorder %s275_s30, %s432_s0 }
  0x17   :  { %p281_p10 = pnand %p279_p9, %p276_p8 }
  0x19   :  { %284 = shalt.err (!%p281_p10)
}
  0x1a   :  { %s285_s8 = scalar_lea.vmem %s377_s15, 128  ;;  %p290_p12 = scmp.lt.s32.totalorder %s377_s15, %s377_s15 }
  0x1b   :  { %p286_p11 = scmp.ne.s32.totalorder %s377_s15, %s285_s8  ;;  %p291_p13 = scmp.lt.s32.totalorder %s285_s8, %s285_s8 }
  0x1d   :  { %p292_p0 = por %p291_p13, %p290_p12 }
  0x1f   :  { %p293_p1 = pnand %p292_p0, %p286_p11 }
  0x21   :  { %296 = shalt.err (!%p293_p1)
}
  0x22   :  { %22 = dma.hbm_to_vmem [thread:$0]  %s432_s0, 128, %s377_s15, [#allocation3], %s349_s24, %s349_s24, %s350_s25  }
  0x23   :  { %s351_s10 = smov [#allocation7]   ;;  %s297_s14 = scalar_lea.hbm %s434_s2, 16 }
  0x24   :  { %s41_s11 = sshll.u32 %s351_s10, 4  ;;  %p298_p2 = scmp.ne.s32.totalorder %s434_s2, %s297_s14  ;;  %s42_s11 = int_to_ptr.vmem [resolvable:$true] %s41_s11 }
  0x25   :  { %p301_p3 = scmp.lt.u32.totalorder %s297_s14, %s434_s2 }
  0x27   :  { %p303_p4 = pnand %p301_p3, %p298_p2 }
  0x29   :  { %306 = shalt.err (!%p303_p4)
}
  0x2a   :  { %s307_s20 = scalar_lea.vmem %s42_s11, 16  ;;  %s311_s0 = scalar_lea.vmem %s42_s11, 32 }
  0x2b   :  { %p308_p5 = scmp.ne.s32.totalorder %s42_s11, %s307_s20  ;;  %p312_p6 = scmp.lt.s32.totalorder %s42_s11, %s42_s11 }
  0x2c   :  { %p313_p7 = scmp.lt.s32.totalorder %s311_s0, %s307_s20 }
  0x2e   :  { %p314_p8 = por %p313_p7, %p312_p6 }
  0x30   :  { %p315_p9 = pnand %p314_p8, %p308_p5 }
  0x32   :  { %318 = shalt.err (!%p315_p9)
}
  0x33   :  { %44 = dma.hbm_to_vmem [thread:$0]  %s434_s2, 16, %s42_s11, [#allocation6]  }
  0x34   :  { %341 = dma.done.wait [#allocation3], 128  }
  0x35   :  { %342 = vsyncadd [#allocation3], 4294967168 }
  0x36   :  { %343 = dma.done.wait [#allocation6], 1040  }
  0x37   :  { %344 = vsyncadd [#allocation6], 4294966256  ;;  %v352_v0 = vmov 0.0   ;;  %vm353_vm0 = vmmov 0   ;;  %v244_v1 = vld [vmem:[#allocation5] sm:$0xff]   ;;  %v245_v2 = vld [vmem:[#allocation5 + $0x8] sm:$0xff]  }
  0x38   :  { %214 = vmatprep.subr.bf16.mxu0 %v352_v0  ;;  %230 = vmatprep.mubr.msk.bf16.mxu0 %vm353_vm0, %v352_v0  ;;  %v246_v3 = vld [vmem:[#allocation5 + $0x10] sm:$0xff]   ;;  %v247_v4 = vld [vmem:[#allocation5 + $0x18] sm:$0xff]   ;;  %v248_v5 = vld [vmem:[#allocation5 + $0x20] sm:$0xff]   ;;  %s354_s2 = smov [#allocation8]  }
  0x39   :  { %215 = vmatpush3.bf16.msra.mxu0 %v244_v1  ;;  %v249_v6 = vld [vmem:[#allocation5 + $0x28] sm:$0xff]   ;;  %v250_v7 = vld [vmem:[#allocation5 + $0x30] sm:$0xff]   ;;  %v251_v8 = vld [vmem:[#allocation5 + $0x38] sm:$0xff]   ;;  %s182_s22 = sshll.u32 %s354_s2, 4  ;;  %s183_s22 = int_to_ptr.vmem [resolvable:$true] %s182_s22 }
  0x3a   :  { %216 = vmatprep.subr.bf16.mxu0 %v352_v0  ;;  %v252_v9 = vld [vmem:[#allocation2] sm:$0xff]   ;;  %v195_v10 = vld [vmem:[#allocation7] ss:$0 sm:$0xff]  ;;  %s319_s23 = scalar_lea.vmem %s183_s22, 256  ;;  %p324_p11 = scmp.lt.s32.totalorder %s183_s22, %s183_s22 }
  0x3b   :  { %p320_p10 = scmp.ne.s32.totalorder %s183_s22, %s319_s23  ;;  %p325_p12 = scmp.lt.s32.totalorder %s319_s23, %s319_s23 }
  0x3d   :  { %217 = vmatpush3.bf16.msra.mxu0 %v245_v2  ;;  %p326_p13 = por %p325_p12, %p324_p11 }
  0x3e   :  { %218 = vmatprep.subr.bf16.mxu0 %v352_v0 }
  0x3f   :  { %p327_p0 = pnand %p326_p13, %p320_p10 }
  0x41   :  { %219 = vmatpush3.bf16.msra.mxu0 %v246_v3 }
  0x42   :  { %220 = vmatprep.subr.bf16.mxu0 %v352_v0 }
  0x45   :  { %221 = vmatpush3.bf16.msra.mxu0 %v247_v4 }
  0x46   :  { %222 = vmatprep.subr.bf16.mxu0 %v352_v0 }
  0x49   :  { %223 = vmatpush3.bf16.msra.mxu0 %v248_v5 }
  0x4a   :  { %224 = vmatprep.subr.bf16.mxu0 %v352_v0 }
  0x4d   :  { %225 = vmatpush3.bf16.msra.mxu0 %v249_v6 }
  0x4e   :  { %226 = vmatprep.subr.bf16.mxu0 %v352_v0 }
  0x51   :  { %227 = vmatpush3.bf16.msra.mxu0 %v250_v7 }
  0x52   :  { %228 = vmatprep.subr.bf16.mxu0 %v352_v0 }
  0x55   :  { %229 = vmatpush3.bf16.msra.mxu0 %v251_v8 }
  0x58   :  { %231 = vmatmul.mubr.bf16.vlgmr.msra.gmra.mrb[0].mxu0 %v252_v9 }
 0x12b   :  { %v168_v11 = vpop.f32.mrb[0].mxu0 }
 0x12c   :  { %v169_v12 = vadd.f32 %v195_v10, %v168_v11  ;;  %v232_v13 = vpop.f32.mrb[1].mxu0 }
 0x12d   :  { %v171_v14 = vpop.f32.mrb[2].mxu0 }
 0x12e   :  { %175 = vst [vmem:[#allocation8] sm:$0xff] %v169_v12  ;;  %v172_v15 = vadd.f32 %v195_v10, %v171_v14  ;;  %v233_v16 = vpop.f32.mrb[3].mxu0 }
 0x130   :  { %176 = vst [vmem:[#allocation8 + $0x8] sm:$0xff] %v172_v15 }
 0x131   :  { %330 = shalt.err (!%p327_p0)
}
 0x132   :  { %s331_s26 = scalar_lea.hbm %s435_s3, 256 }
 0x133   :  { %p332_p1 = scmp.ne.s32.totalorder %s435_s3, %s331_s26  ;;  %p335_p2 = scmp.lt.u32.totalorder %s331_s26, %s435_s3 }
 0x135   :  { %p337_p3 = pnand %p335_p2, %p332_p1 }
 0x137   :  { %340 = shalt.err (!%p337_p3)
}
 0x138   :  { %s355_s4 = smov 128   ;;  %s356_s5 = smov 8  }
 0x139   :  { %188 = dma.vmem_to_hbm [thread:$0]  %s183_s22, 256, %s435_s3, [#allocation4], %s355_s4, %s355_s4, %s356_s5  }
 0x13a   :  { %345 = dma.done.wait [#allocation4], 256  }
 0x13b   :  { %346 = vsyncadd [#allocation4], 4294967040 }
 0x13c   :  { %192 = vsyncpa [#allocation3], 1 }
 0x13d   :  { %193 = vsyncpa [#allocation6], 1 }
 0x13e   :  { %194 = vsyncpa [#allocation4], 1 }

// kernel: my_lstm_forward.3
= control target key start
LH: loop header
LB: loop body
LE: loop exit
PB: predicated region body
PF: predicated region fallthrough
CT: control target
= control target key end

     0   :  { %9 = vsyncpa [#allocation6], 0  ;;  %s5341_s0 = inlined_call_operand.hbm [shape: bf16[128,128], index: 0, kind: input, shape index: {}]   ;;  %s5342_s1 = inlined_call_operand.hbm [shape: bf16[128,512], index: 1, kind: input, shape index: {}]   ;;  %s5343_s2 = inlined_call_operand.hbm [shape: bf16[128,512], index: 2, kind: input, shape index: {}]   ;;  %s5344_s3 = inlined_call_operand.hbm [shape: f32[1,512], index: 3, kind: input, shape index: {}]   ;;  %s5345_s4 = inlined_call_operand.hbm [shape: bf16[128,128], index: 4, kind: output, shape index: {}]  }
   0x1   :  { %10 = vsyncpa [#allocation9], 0 }
   0x2   :  { %11 = vsyncpa [#allocation12], 0 }
   0x3   :  { %12 = vsyncpa [#allocation7], 0  ;;  %s4558_s15 = smov [#allocation8]   ;;  %s4440_s19 = scalar_lea.hbm %s5342_s1, 4096 }
   0x4   :  { %s30_s16 = sshll.u32 %s4558_s15, 4  ;;  %p4441_p0 = scmp.ne.s32.totalorder %s5342_s1, %s4440_s19  ;;  %s31_s16 = int_to_ptr.vmem [resolvable:$true] %s30_s16 }
   0x5   :  { %p4444_p1 = scmp.lt.u32.totalorder %s4440_s19, %s5342_s1 }
   0x7   :  { %p4446_p2 = pnand %p4444_p1, %p4441_p0 }
   0x9   :  { %4449 = shalt.err (!%p4446_p2)
}
   0xa   :  { %s4450_s24 = scalar_lea.vmem %s31_s16, 4096  ;;  %p4455_p4 = scmp.lt.s32.totalorder %s31_s16, %s31_s16 }
   0xb   :  { %p4451_p3 = scmp.ne.s32.totalorder %s31_s16, %s4450_s24  ;;  %p4456_p5 = scmp.lt.s32.totalorder %s4450_s24, %s4450_s24 }
   0xd   :  { %p4457_p6 = por %p4456_p5, %p4455_p4 }
   0xf   :  { %p4458_p7 = pnand %p4457_p6, %p4451_p3 }
  0x11   :  { %4461 = shalt.err (!%p4458_p7)
}
  0x12   :  { %s4559_s25 = smov 256   ;;  %s4560_s26 = smov 16  }
  0x13   :  { %36 = dma.hbm_to_vmem [thread:$0]  %s5342_s1, 4096, %s31_s16, [#allocation9], %s4559_s25, %s4559_s25, %s4560_s26  }
  0x14   :  { %s4561_s29 = smov [#allocation5]   ;;  %s4462_s7 = scalar_lea.hbm %s5341_s0, 1024 }
  0x15   :  { %s18_s30 = sshll.u32 %s4561_s29, 4  ;;  %p4463_p8 = scmp.ne.s32.totalorder %s5341_s0, %s4462_s7  ;;  %s19_s30 = int_to_ptr.vmem [resolvable:$true] %s18_s30 }
  0x16   :  { %p4466_p9 = scmp.lt.u32.totalorder %s4462_s7, %s5341_s0 }
  0x18   :  { %p4468_p10 = pnand %p4466_p9, %p4463_p8 }
  0x1a   :  { %4471 = shalt.err (!%p4468_p10)
}
  0x1b   :  { %s4472_s12 = scalar_lea.vmem %s19_s30, 1024  ;;  %p4477_p12 = scmp.lt.s32.totalorder %s19_s30, %s19_s30 }
  0x1c   :  { %p4473_p11 = scmp.ne.s32.totalorder %s19_s30, %s4472_s12  ;;  %p4478_p13 = scmp.lt.s32.totalorder %s4472_s12, %s4472_s12 }
  0x1e   :  { %p4479_p0 = por %p4478_p13, %p4477_p12 }
  0x20   :  { %p4480_p1 = pnand %p4479_p0, %p4473_p11 }
  0x22   :  { %4483 = shalt.err (!%p4480_p1)
}
  0x23   :  { %s4562_s1 = smov 64   ;;  %s4563_s13 = smov 4  }
  0x24   :  { %24 = dma.hbm_to_vmem [thread:$0]  %s5341_s0, 1024, %s19_s30, [#allocation6], %s4562_s1, %s4562_s1, %s4563_s13  }
  0x25   :  { %s4564_s16 = smov [#allocation10]   ;;  %s4565_s18 = smov [#allocation11]  }
  0x26   :  { %s42_s17 = sshll.u32 %s4564_s16, 4  ;;  %s55_s19 = sshll.u32 %s4565_s18, 4  ;;  %s43_s17 = int_to_ptr.vmem [resolvable:$true] %s42_s17  ;;  %s56_s19 = int_to_ptr.vmem [resolvable:$true] %s55_s19 }
  0x27   :  { %s4484_s22 = scalar_lea.hbm %s5343_s2, 4096 }
  0x28   :  { %p4485_p2 = scmp.ne.s32.totalorder %s5343_s2, %s4484_s22  ;;  %p4488_p3 = scmp.lt.u32.totalorder %s4484_s22, %s5343_s2 }
  0x2a   :  { %p4490_p4 = pnand %p4488_p3, %p4485_p2 }
  0x2c   :  { %4493 = shalt.err (!%p4490_p4)
}
  0x2d   :  { %s4494_s0 = scalar_lea.vmem %s43_s17, 4096  ;;  %p4499_p6 = scmp.lt.s32.totalorder %s43_s17, %s43_s17 }
  0x2e   :  { %p4495_p5 = scmp.ne.s32.totalorder %s43_s17, %s4494_s0  ;;  %p4500_p7 = scmp.lt.s32.totalorder %s4494_s0, %s4494_s0 }
  0x30   :  { %p4501_p8 = por %p4500_p7, %p4499_p6 }
  0x32   :  { %p4502_p9 = pnand %p4501_p8, %p4495_p5 }
  0x34   :  { %4505 = shalt.err (!%p4502_p9)
}
  0x35   :  { %48 = dma.hbm_to_vmem [thread:$0]  %s5343_s2, 4096, %s43_s17, [#allocation9], %s4559_s25, %s4559_s25, %s4560_s26  }
  0x36   :  { %s4506_s7 = scalar_lea.hbm %s5344_s3, 64 }
  0x37   :  { %p4507_p10 = scmp.ne.s32.totalorder %s5344_s3, %s4506_s7  ;;  %p4510_p11 = scmp.lt.u32.totalorder %s4506_s7, %s5344_s3 }
  0x39   :  { %p4512_p12 = pnand %p4510_p11, %p4507_p10 }
  0x3b   :  { %4515 = shalt.err (!%p4512_p12)
}
  0x3c   :  { %s4516_s12 = scalar_lea.vmem %s56_s19, 64  ;;  %p4521_p0 = scmp.lt.s32.totalorder %s56_s19, %s56_s19 }
  0x3d   :  { %p4517_p13 = scmp.ne.s32.totalorder %s56_s19, %s4516_s12  ;;  %p4522_p1 = scmp.lt.s32.totalorder %s4516_s12, %s4516_s12 }
  0x3f   :  { %p4523_p2 = por %p4522_p1, %p4521_p0 }
  0x41   :  { %p4524_p3 = pnand %p4523_p2, %p4517_p13 }
  0x43   :  { %4527 = shalt.err (!%p4524_p3)
}
  0x44   :  { %58 = dma.hbm_to_vmem [thread:$0]  %s5344_s3, 64, %s56_s19, [#allocation12]  }
  0x45   :  { %4550 = dma.done.wait [#allocation6], 1024  }
  0x46   :  { %4551 = vsyncadd [#allocation6], 4294966272 }
  0x47   :  { %4552 = dma.done.wait [#allocation9], 8192  }
  0x48   :  { %4553 = vsyncadd [#allocation9], 4294959104 }
  0x49   :  { %4554 = dma.done.wait [#allocation12], 64  }
  0x4a   :  { %4555 = vsyncadd [#allocation12], 4294967232  ;;  %v5346_v0 = vmov 0   ;;  %v3984_v1 = vld [vmem:[#allocation8 + $0x4] ss:$16 sps:$4 sm:$0xff]   ;;  %v4036_v43 = vld [vmem:[#allocation5 + $0x8] sm:$0xff]  }
  0x4b   :  { %389 = vmatprep.mubr.bf16.mxu0 %v5346_v0  ;;  %502 = vmatprep.mubr.bf16.mxu1 %v5346_v0  ;;  %v3986_v2 = vld [vmem:[#allocation8 + $0xc] ss:$16 sps:$4 sm:$0xff]   ;;  %v3988_v3 = vld [vmem:[#allocation8] ss:$16 sps:$4 sm:$0xff]   ;;  %v3989_v4 = vld [vmem:[#allocation8 + $0x8] ss:$16 sps:$4 sm:$0xff]  }
  0x4c   :  { %357 = vmatprep.subr.bf16.mxu0 %v3984_v1  ;;  %470 = vmatprep.subr.bf16.mxu1 %v3986_v2  ;;  %v3990_v5 = vld [vmem:[#allocation8 + $0x24] ss:$16 sps:$4 sm:$0xff]   ;;  %v3992_v6 = vld [vmem:[#allocation8 + $0x2c] ss:$16 sps:$4 sm:$0xff]   ;;  %v3994_v7 = vld [vmem:[#allocation8 + $0x20] ss:$16 sps:$4 sm:$0xff]  }
  0x4d   :  { %358 = vmatpush1.bf16.msra.mxu0 %v3988_v3  ;;  %471 = vmatpush1.bf16.msra.mxu1 %v3989_v4  ;;  %v3995_v8 = vld [vmem:[#allocation8 + $0x28] ss:$16 sps:$4 sm:$0xff]   ;;  %v3996_v9 = vld [vmem:[#allocation8 + $0x44] ss:$16 sps:$4 sm:$0xff]   ;;  %v3998_v10 = vld [vmem:[#allocation8 + $0x4c] ss:$16 sps:$4 sm:$0xff]  }
  0x4e   :  { %359 = vmatprep.subr.bf16.mxu0 %v3990_v5  ;;  %472 = vmatprep.subr.bf16.mxu1 %v3992_v6  ;;  %v4000_v11 = vld [vmem:[#allocation8 + $0x40] ss:$16 sps:$4 sm:$0xff]   ;;  %v4001_v12 = vld [vmem:[#allocation8 + $0x48] ss:$16 sps:$4 sm:$0xff]   ;;  %v4002_v13 = vld [vmem:[#allocation8 + $0x64] ss:$16 sps:$4 sm:$0xff]  }
  0x4f   :  { %v4004_v14 = vld [vmem:[#allocation8 + $0x6c] ss:$16 sps:$4 sm:$0xff]   ;;  %v4006_v15 = vld [vmem:[#allocation8 + $0x60] ss:$16 sps:$4 sm:$0xff]   ;;  %v4007_v16 = vld [vmem:[#allocation8 + $0x68] ss:$16 sps:$4 sm:$0xff]  }
  0x50   :  { %v4008_v17 = vld [vmem:[#allocation8 + $0x84] ss:$16 sps:$4 sm:$0xff]   ;;  %v4010_v18 = vld [vmem:[#allocation8 + $0x8c] ss:$16 sps:$4 sm:$0xff]   ;;  %v4012_v19 = vld [vmem:[#allocation8 + $0x80] ss:$16 sps:$4 sm:$0xff]  }
  0x51   :  { %360 = vmatpush1.bf16.msra.mxu0 %v3994_v7  ;;  %473 = vmatpush1.bf16.msra.mxu1 %v3995_v8  ;;  %v4013_v20 = vld [vmem:[#allocation8 + $0x88] ss:$16 sps:$4 sm:$0xff]   ;;  %v4014_v21 = vld [vmem:[#allocation8 + $0xa4] ss:$16 sps:$4 sm:$0xff]   ;;  %v4016_v22 = vld [vmem:[#allocation8 + $0xac] ss:$16 sps:$4 sm:$0xff]  }
  0x52   :  { %361 = vmatprep.subr.bf16.mxu0 %v3996_v9  ;;  %474 = vmatprep.subr.bf16.mxu1 %v3998_v10  ;;  %v4018_v23 = vld [vmem:[#allocation8 + $0xa0] ss:$16 sps:$4 sm:$0xff]   ;;  %v4019_v24 = vld [vmem:[#allocation8 + $0xa8] ss:$16 sps:$4 sm:$0xff]   ;;  %v4020_v25 = vld [vmem:[#allocation8 + $0xc4] ss:$16 sps:$4 sm:$0xff]   ;;  %v129_v10 = vlaneseq }
  0x53   :  { %v4022_v26 = vld [vmem:[#allocation8 + $0xcc] ss:$16 sps:$4 sm:$0xff]   ;;  %v4024_v27 = vld [vmem:[#allocation8 + $0xc0] ss:$16 sps:$4 sm:$0xff]   ;;  %v4025_v28 = vld [vmem:[#allocation8 + $0xc8] ss:$16 sps:$4 sm:$0xff]  }
  0x54   :  { %v4026_v29 = vld [vmem:[#allocation8 + $0xe4] ss:$16 sps:$4 sm:$0xff]   ;;  %v4028_v30 = vld [vmem:[#allocation8 + $0xec] ss:$16 sps:$4 sm:$0xff]   ;;  %v4030_v31 = vld [vmem:[#allocation8 + $0xe0] ss:$16 sps:$4 sm:$0xff]  }
  0x55   :  { %362 = vmatpush1.bf16.msra.mxu0 %v4000_v11  ;;  %475 = vmatpush1.bf16.msra.mxu1 %v4001_v12  ;;  %v4031_v32 = vld [vmem:[#allocation8 + $0xe8] ss:$16 sps:$4 sm:$0xff]   ;;  %v4652_v33 = vld [vmem:[#allocation10 + $0x4] ss:$16 sps:$4 sm:$0xff]   ;;  %v4654_v34 = vld [vmem:[#allocation10 + $0xc] ss:$16 sps:$4 sm:$0xff]  }
  0x56   :  { %363 = vmatprep.subr.bf16.mxu0 %v4002_v13  ;;  %476 = vmatprep.subr.bf16.mxu1 %v4004_v14  ;;  %v4032_v35 = vld [vmem:[#allocation5] sm:$0xff]   ;;  %v4662_v38 = vld [vmem:[#allocation10 + $0x8] ss:$16 sps:$4 sm:$0xff]   ;;  %v4664_v39 = vld [vmem:[#allocation10 + $0x2c] ss:$16 sps:$4 sm:$0xff]   ;;  %v130_v11 = vshrl.u32 %v129_v10, 7 }
  0x57   :  { %v4656_v36 = vld [vmem:[#allocation10] ss:$16 sps:$4 sm:$0xff]   ;;  %v4659_v37 = vld [vmem:[#allocation10 + $0x24] ss:$16 sps:$4 sm:$0xff]   ;;  %v4675_v42 = vld [vmem:[#allocation10 + $0x28] ss:$16 sps:$4 sm:$0xff]  }
  0x58   :  { %v4668_v40 = vld [vmem:[#allocation10 + $0x20] ss:$16 sps:$4 sm:$0xff]   ;;  %v4672_v41 = vld [vmem:[#allocation10 + $0x44] ss:$16 sps:$4 sm:$0xff]   ;;  %v4684_v46 = vld [vmem:[#allocation10 + $0x4c] ss:$16 sps:$4 sm:$0xff]  }
  0x59   :  { %364 = vmatpush1.bf16.msra.mxu0 %v4006_v15  ;;  %477 = vmatpush1.bf16.msra.mxu1 %v4007_v16  ;;  %v4679_v44 = vld [vmem:[#allocation10 + $0x40] ss:$16 sps:$4 sm:$0xff]   ;;  %v4682_v45 = vld [vmem:[#allocation10 + $0x64] ss:$16 sps:$4 sm:$0xff]   ;;  %v4687_v47 = vld [vmem:[#allocation10 + $0x48] ss:$16 sps:$4 sm:$0xff]  }
  0x5a   :  { %365 = vmatprep.subr.bf16.mxu0 %v4008_v17  ;;  %478 = vmatprep.subr.bf16.mxu1 %v4010_v18  ;;  %v4689_v48 = vld [vmem:[#allocation10 + $0x6c] ss:$16 sps:$4 sm:$0xff]   ;;  %v4694_v49 = vld [vmem:[#allocation10 + $0x60] ss:$16 sps:$4 sm:$0xff]   ;;  %v4697_v50 = vld [vmem:[#allocation10 + $0x84] ss:$16 sps:$4 sm:$0xff]  }
  0x5b   :  { %v4701_v51 = vld [vmem:[#allocation10 + $0x68] ss:$16 sps:$4 sm:$0xff]   ;;  %v4043_v52 = vld [vmem:[#allocation5 + $0x10] sm:$0xff]   ;;  %v4707_v54 = vld [vmem:[#allocation10 + $0x8c] ss:$16 sps:$4 sm:$0xff]   ;;  %v139_v12 = vsub.s32 2, %v130_v11 }
  0x5c   :  { %v4704_v53 = vld [vmem:[#allocation10 + $0x80] ss:$16 sps:$4 sm:$0xff]   ;;  %v4710_v55 = vld [vmem:[#allocation10 + $0xa4] ss:$16 sps:$4 sm:$0xff]   ;;  %v4713_v56 = vld [vmem:[#allocation10 + $0x88] ss:$16 sps:$4 sm:$0xff]  }
  0x5d   :  { %366 = vmatpush1.bf16.msra.mxu0 %v4012_v19  ;;  %479 = vmatpush1.bf16.msra.mxu1 %v4013_v20  ;;  %v4715_v57 = vld [vmem:[#allocation10 + $0xac] ss:$16 sps:$4 sm:$0xff]   ;;  %v4717_v58 = vld [vmem:[#allocation10 + $0xa0] ss:$16 sps:$4 sm:$0xff]   ;;  %v4721_v59 = vld [vmem:[#allocation10 + $0xc4] ss:$16 sps:$4 sm:$0xff]  }
  0x5e   :  { %367 = vmatprep.subr.bf16.mxu0 %v4014_v21  ;;  %480 = vmatprep.subr.bf16.mxu1 %v4016_v22  ;;  %v4723_v60 = vld [vmem:[#allocation10 + $0xa8] ss:$16 sps:$4 sm:$0xff]   ;;  %v4729_v62 = vld [vmem:[#allocation10 + $0xc0] ss:$16 sps:$4 sm:$0xff]   ;;  %v4732_v63 = vld [vmem:[#allocation10 + $0xcc] ss:$16 sps:$4 sm:$0xff]  }
  0x5f   :  { %v4050_v61 = vld [vmem:[#allocation5 + $0x18] sm:$0xff]   ;;  %v4734_v1 = vld [vmem:[#allocation10 + $0xe4] ss:$16 sps:$4 sm:$0xff]   ;;  %v4743_v4 = vld [vmem:[#allocation10 + $0xe0] ss:$16 sps:$4 sm:$0xff]   ;;  %v143_v13 = vsub.s32 3, %v130_v11 }
  0x60   :  { %v4736_v2 = vld [vmem:[#allocation10 + $0xc8] ss:$16 sps:$4 sm:$0xff]   ;;  %v4739_v3 = vld [vmem:[#allocation10 + $0xec] ss:$16 sps:$4 sm:$0xff]   ;;  %v4057_v6 = vld [vmem:[#allocation5 + $0x20] sm:$0xff]   ;;  %v131_v14 = vsub.s32 0, %v130_v11 }
  0x61   :  { %368 = vmatpush1.bf16.msra.mxu0 %v4018_v23  ;;  %481 = vmatpush1.bf16.msra.mxu1 %v4019_v24  ;;  %v4747_v5 = vld [vmem:[#allocation10 + $0xe8] ss:$16 sps:$4 sm:$0xff]   ;;  %v4071_v8 = vld [vmem:[#allocation5 + $0x30] sm:$0xff]   ;;  %v127_v15 = vld [vmem:[#allocation11] sm:$0xf]  ;;  %v135_v16 = vsub.s32 1, %v130_v11 }
  0x62   :  { %369 = vmatprep.subr.bf16.mxu0 %v4020_v25  ;;  %482 = vmatprep.subr.bf16.mxu1 %v4022_v26  ;;  %v4064_v7 = vld [vmem:[#allocation5 + $0x28] sm:$0xff]   ;;  %v4078_v9 = vld [vmem:[#allocation5 + $0x38] sm:$0xff]   ;;  %v4800_v17 = vrot.slane %v127_v15, %v139_v12  ;;  %v4802_v18 = vrot.slane %v127_v15, %v143_v13  ;;  %v4804_v19 = vrot.slane %v127_v15, %v131_v14  ;;  %s4567_s3 = smov [#allocation13]  }
  0x63   :  { %v4806_v21 = vrot.slane %v127_v15, %v135_v16  ;;  %s3537_s26 = sshll.u32 %s4567_s3, 4  ;;  %s3538_s26 = int_to_ptr.vmem [resolvable:$true] %s3537_s26 }
  0x64   :  { %s4528_s14 = scalar_lea.vmem %s3538_s26, 1024  ;;  %p4533_p5 = scmp.lt.s32.totalorder %s3538_s26, %s3538_s26 }
  0x65   :  { %370 = vmatpush1.bf16.msra.mxu0 %v4024_v27  ;;  %483 = vmatpush1.bf16.msra.mxu1 %v4025_v28  ;;  %p4529_p4 = scmp.ne.s32.totalorder %s3538_s26, %s4528_s14  ;;  %p4534_p6 = scmp.lt.s32.totalorder %s4528_s14, %s4528_s14 }
  0x66   :  { %371 = vmatprep.subr.bf16.mxu0 %v4026_v29  ;;  %484 = vmatprep.subr.bf16.mxu1 %v4028_v30 }
  0x67   :  { %p4535_p7 = por %p4534_p6, %p4533_p5 }
  0x69   :  { %372 = vmatpush1.bf16.msra.mxu0 %v4030_v31  ;;  %485 = vmatpush1.bf16.msra.mxu1 %v4031_v32  ;;  %p4536_p8 = pnand %p4535_p7, %p4529_p4 }
  0x6a   :  { %849 = vmatprep.subr.bf16.mxu0 %v4652_v33  ;;  %892 = vmatprep.subr.bf16.mxu1 %v4654_v34 }
  0x6c   :  { %390 = vmatmul.mubr.bf16.vlgmr.msra.gmra.mrb[0].mxu0 %v4032_v35  ;;  %503 = vmatmul.mubr.bf16.vlgmr.msra.gmra.mrb[0].mxu1 %v4032_v35 }
  0x6d   :  { %850 = vmatpush1.bf16.msra.mxu0 %v4656_v36  ;;  %399 = vmatprep.mubr.bf16.mxu0 %v5346_v0 }
  0x6e   :  { %512 = vmatprep.mubr.bf16.mxu1 %v5346_v0  ;;  %851 = vmatprep.subr.bf16.mxu0 %v4659_v37 }
  0x6f   :  { %893 = vmatpush1.bf16.msra.mxu1 %v4662_v38 }
  0x70   :  { %894 = vmatprep.subr.bf16.mxu1 %v4664_v39 }
  0x71   :  { %852 = vmatpush1.bf16.msra.mxu0 %v4668_v40 }
  0x72   :  { %853 = vmatprep.subr.bf16.mxu0 %v4672_v41 }
  0x73   :  { %895 = vmatpush1.bf16.msra.mxu1 %v4675_v42 }
  0x74   :  { %400 = vmatmul.mubr.bf16.gmra.mrb[4].mxu0 %v4036_v43  ;;  %513 = vmatmul.mubr.bf16.gmra.mrb[4].mxu1 %v4036_v43 }
  0x75   :  { %409 = vmatprep.mubr.bf16.mxu0 %v5346_v0  ;;  %522 = vmatprep.mubr.bf16.mxu1 %v5346_v0 }
  0x76   :  { %854 = vmatpush1.bf16.msra.mxu0 %v4679_v44  ;;  %896 = vmatprep.subr.bf16.mxu1 %v4684_v46 }
  0x77   :  { %855 = vmatprep.subr.bf16.mxu0 %v4682_v45  ;;  %897 = vmatpush1.bf16.msra.mxu1 %v4687_v47 }
  0x78   :  { %898 = vmatprep.subr.bf16.mxu1 %v4689_v48 }
  0x7a   :  { %856 = vmatpush1.bf16.msra.mxu0 %v4694_v49 }
  0x7b   :  { %857 = vmatprep.subr.bf16.mxu0 %v4697_v50  ;;  %899 = vmatpush1.bf16.msra.mxu1 %v4701_v51 }
  0x7c   :  { %410 = vmatmul.mubr.bf16.gmra.mrb[8].mxu0 %v4043_v52  ;;  %523 = vmatmul.mubr.bf16.gmra.mrb[8].mxu1 %v4043_v52 }
  0x7d   :  { %419 = vmatprep.mubr.bf16.mxu0 %v5346_v0  ;;  %532 = vmatprep.mubr.bf16.mxu1 %v5346_v0 }
  0x7e   :  { %858 = vmatpush1.bf16.msra.mxu0 %v4704_v53  ;;  %900 = vmatprep.subr.bf16.mxu1 %v4707_v54 }
  0x7f   :  { %859 = vmatprep.subr.bf16.mxu0 %v4710_v55  ;;  %901 = vmatpush1.bf16.msra.mxu1 %v4713_v56 }
  0x80   :  { %902 = vmatprep.subr.bf16.mxu1 %v4715_v57 }
  0x82   :  { %860 = vmatpush1.bf16.msra.mxu0 %v4717_v58 }
  0x83   :  { %861 = vmatprep.subr.bf16.mxu0 %v4721_v59  ;;  %903 = vmatpush1.bf16.msra.mxu1 %v4723_v60 }
  0x84   :  { %420 = vmatmul.mubr.bf16.gmra.mrb[12].mxu0 %v4050_v61  ;;  %533 = vmatmul.mubr.bf16.gmra.mrb[12].mxu1 %v4050_v61 }
  0x85   :  { %429 = vmatprep.mubr.bf16.mxu0 %v5346_v0  ;;  %542 = vmatprep.mubr.bf16.mxu1 %v5346_v0 }
  0x86   :  { %862 = vmatpush1.bf16.msra.mxu0 %v4729_v62  ;;  %904 = vmatprep.subr.bf16.mxu1 %v4732_v63 }
  0x87   :  { %863 = vmatprep.subr.bf16.mxu0 %v4734_v1  ;;  %905 = vmatpush1.bf16.msra.mxu1 %v4736_v2 }
  0x88   :  { %906 = vmatprep.subr.bf16.mxu1 %v4739_v3 }
  0x8a   :  { %864 = vmatpush1.bf16.msra.mxu0 %v4743_v4 }
  0x8b   :  { %907 = vmatpush1.bf16.msra.mxu1 %v4747_v5  ;;  %1208 = vmatprep.subr.bf16.mxu0 %v4652_v33 }
  0x8c   :  { %430 = vmatmul.mubr.bf16.gmra.mrb[16].mxu0 %v4057_v6  ;;  %543 = vmatmul.mubr.bf16.gmra.mrb[16].mxu1 %v4057_v6 }
  0x8d   :  { %439 = vmatprep.mubr.bf16.mxu0 %v5346_v0  ;;  %552 = vmatprep.mubr.bf16.mxu1 %v5346_v0 }
  0x8e   :  { %1251 = vmatprep.subr.bf16.mxu1 %v4654_v34 }
  0x94   :  { %440 = vmatmul.mubr.bf16.gmra.mrb[20].mxu0 %v4064_v7  ;;  %553 = vmatmul.mubr.bf16.gmra.mrb[20].mxu1 %v4064_v7 }
  0x95   :  { %449 = vmatprep.mubr.bf16.mxu0 %v5346_v0  ;;  %562 = vmatprep.mubr.bf16.mxu1 %v5346_v0 }
  0x9c   :  { %450 = vmatmul.mubr.bf16.gmra.mrb[24].mxu0 %v4071_v8  ;;  %563 = vmatmul.mubr.bf16.gmra.mrb[24].mxu1 %v4071_v8 }
  0x9d   :  { %459 = vmatprep.mubr.bf16.mxu0 %v5346_v0  ;;  %572 = vmatprep.mubr.bf16.mxu1 %v5346_v0 }
  0xa4   :  { %460 = vmatmul.mubr.bf16.gmra.mrb[28].mxu0 %v4078_v9  ;;  %573 = vmatmul.mubr.bf16.gmra.mrb[28].mxu1 %v4078_v9 }
  0xa5   :  { %881 = vmatprep.mubr.bf16.mxu0 %v5346_v0  ;;  %924 = vmatprep.mubr.bf16.mxu1 %v5346_v0 }
  0xac   :  { %882 = vmatmul.mubr.bf16.vlgmr.msra.gmra.mrb[32].mxu0 %v5346_v0  ;;  %925 = vmatmul.mubr.bf16.vlgmr.msra.gmra.mrb[32].mxu1 %v5346_v0 }
  0xad   :  { %1209 = vmatpush1.bf16.msra.mxu0 %v4656_v36  ;;  %1252 = vmatpush1.bf16.msra.mxu1 %v4662_v38 }
  0xae   :  { %1210 = vmatprep.subr.bf16.mxu0 %v4659_v37  ;;  %1253 = vmatprep.subr.bf16.mxu1 %v4664_v39 }
  0xaf   :  { %1240 = vmatprep.mubr.bf16.mxu0 %v5346_v0  ;;  %1283 = vmatprep.mubr.bf16.mxu1 %v5346_v0 }
  0xb1   :  { %1211 = vmatpush1.bf16.msra.mxu0 %v4668_v40  ;;  %1254 = vmatpush1.bf16.msra.mxu1 %v4675_v42 }
  0xb2   :  { %1212 = vmatprep.subr.bf16.mxu0 %v4672_v41  ;;  %1255 = vmatprep.subr.bf16.mxu1 %v4684_v46 }
  0xb5   :  { %1213 = vmatpush1.bf16.msra.mxu0 %v4679_v44  ;;  %1256 = vmatpush1.bf16.msra.mxu1 %v4687_v47 }
  0xb6   :  { %1214 = vmatprep.subr.bf16.mxu0 %v4682_v45  ;;  %1257 = vmatprep.subr.bf16.mxu1 %v4689_v48 }
  0xb9   :  { %1215 = vmatpush1.bf16.msra.mxu0 %v4694_v49  ;;  %1258 = vmatpush1.bf16.msra.mxu1 %v4701_v51 }
  0xba   :  { %1216 = vmatprep.subr.bf16.mxu0 %v4697_v50  ;;  %1259 = vmatprep.subr.bf16.mxu1 %v4707_v54 }
  0xbd   :  { %1217 = vmatpush1.bf16.msra.mxu0 %v4704_v53  ;;  %1260 = vmatpush1.bf16.msra.mxu1 %v4713_v56 }
  0xbe   :  { %1218 = vmatprep.subr.bf16.mxu0 %v4710_v55  ;;  %1261 = vmatprep.subr.bf16.mxu1 %v4715_v57 }
  0xc1   :  { %1219 = vmatpush1.bf16.msra.mxu0 %v4717_v58  ;;  %1262 = vmatpush1.bf16.msra.mxu1 %v4723_v60 }
  0xc2   :  { %1220 = vmatprep.subr.bf16.mxu0 %v4721_v59  ;;  %1263 = vmatprep.subr.bf16.mxu1 %v4732_v63 }
  0xc5   :  { %1221 = vmatpush1.bf16.msra.mxu0 %v4729_v62  ;;  %1264 = vmatpush1.bf16.msra.mxu1 %v4736_v2 }
  0xc6   :  { %1222 = vmatprep.subr.bf16.mxu0 %v4734_v1  ;;  %1265 = vmatprep.subr.bf16.mxu1 %v4739_v3 }
  0xc9   :  { %1223 = vmatpush1.bf16.msra.mxu0 %v4743_v4  ;;  %1266 = vmatpush1.bf16.msra.mxu1 %v4747_v5 }
 0x13f   :  { %v391_v20 = vpop.f32.mrb[0].mxu0  ;;  %v504_v22 = vpop.f32.mrb[0].mxu1 }
 0x140   :  { %v393_v23 = vpop.f32.mrb[1].mxu0  ;;  %v505_v24 = vadd.f32 %v504_v22, %v4800_v17  ;;  %v506_v25 = vpop.f32.mrb[1].mxu1  ;;  %v392_v29 = vadd.f32 %v391_v20, %v4804_v19 }
 0x141   :  { %v395_v26 = vpop.f32.mrb[2].mxu0  ;;  %v507_v27 = vadd.f32 %v506_v25, %v4802_v18  ;;  %v508_v28 = vpop.f32.mrb[2].mxu1  ;;  %v394_v34 = vadd.f32 %v393_v23, %v4806_v21 }
 0x142   :  { %v396_v30 = vadd.f32 %v395_v26, %v4804_v19  ;;  %v397_v31 = vpop.f32.mrb[3].mxu0  ;;  %v509_v32 = vadd.f32 %v508_v28, %v4800_v17  ;;  %v510_v33 = vpop.f32.mrb[3].mxu1 }
 0x143   :  { %v398_v35 = vadd.f32 %v397_v31, %v4806_v21  ;;  %v511_v36 = vadd.f32 %v510_v33, %v4802_v18 }
 0x144   :  { %v4816_v37 = vpack.c.bf16 %v396_v30, %v392_v29  ;;  %v4818_v38 = vpack.c.bf16 %v509_v32, %v505_v24 }
 0x145   :  { %v4820_v39 = vpack.c.bf16 %v398_v35, %v394_v34  ;;  %v4822_v40 = vpack.c.bf16 %v511_v36, %v507_v27 }
 0x147   :  { %v401_v41 = vpop.f32.mrb[4].mxu0  ;;  %v514_v42 = vpop.f32.mrb[4].mxu1 }
 0x148   :  { %v402_v43 = vadd.f32 %v401_v41, %v4804_v19  ;;  %v403_v44 = vpop.f32.mrb[5].mxu0  ;;  %v515_v45 = vadd.f32 %v514_v42, %v4800_v17  ;;  %v516_v49 = vpop.f32.mrb[5].mxu1 }
 0x149   :  { %v404_v50 = vadd.f32 %v403_v44, %v4806_v21  ;;  %v405_v52 = vpop.f32.mrb[6].mxu0  ;;  %v517_v53 = vadd.f32 %v516_v49, %v4802_v18  ;;  %v518_v61 = vpop.f32.mrb[6].mxu1 }
 0x14a   :  { %v406_v6 = vadd.f32 %v405_v52, %v4804_v19  ;;  %v407_v7 = vpop.f32.mrb[7].mxu0  ;;  %v519_v8 = vadd.f32 %v518_v61, %v4800_v17  ;;  %v520_v9 = vpop.f32.mrb[7].mxu1 }
 0x14b   :  { %v408_v10 = vadd.f32 %v407_v7, %v4806_v21  ;;  %v521_v11 = vadd.f32 %v520_v9, %v4802_v18 }
 0x14c   :  { %v4832_v12 = vpack.c.bf16 %v406_v6, %v402_v43  ;;  %v4834_v13 = vpack.c.bf16 %v519_v8, %v515_v45 }
 0x14d   :  { %v4836_v14 = vpack.c.bf16 %v408_v10, %v404_v50  ;;  %v4838_v15 = vpack.c.bf16 %v521_v11, %v517_v53 }
 0x14f   :  { %v411_v16 = vpop.f32.mrb[8].mxu0  ;;  %v524_v20 = vpop.f32.mrb[8].mxu1 }
 0x150   :  { %v412_v22 = vadd.f32 %v411_v16, %v4804_v19  ;;  %v413_v23 = vpop.f32.mrb[9].mxu0  ;;  %v525_v24 = vadd.f32 %v524_v20, %v4800_v17  ;;  %v526_v25 = vpop.f32.mrb[9].mxu1 }
 0x151   :  { %v414_v26 = vadd.f32 %v413_v23, %v4806_v21  ;;  %v415_v27 = vpop.f32.mrb[10].mxu0  ;;  %v527_v28 = vadd.f32 %v526_v25, %v4802_v18  ;;  %v528_v29 = vpop.f32.mrb[10].mxu1 }
 0x152   :  { %v416_v30 = vadd.f32 %v415_v27, %v4804_v19  ;;  %v417_v31 = vpop.f32.mrb[11].mxu0  ;;  %v529_v32 = vadd.f32 %v528_v29, %v4800_v17  ;;  %v530_v33 = vpop.f32.mrb[11].mxu1 }
 0x153   :  { %v418_v34 = vadd.f32 %v417_v31, %v4806_v21  ;;  %v531_v35 = vadd.f32 %v530_v33, %v4802_v18 }
 0x154   :  { %v4848_v36 = vpack.c.bf16 %v416_v30, %v412_v22  ;;  %v4850_v41 = vpack.c.bf16 %v529_v32, %v525_v24 }
 0x155   :  { %v4852_v42 = vpack.c.bf16 %v418_v34, %v414_v26  ;;  %v4854_v43 = vpack.c.bf16 %v531_v35, %v527_v28 }
 0x157   :  { %v421_v44 = vpop.f32.mrb[12].mxu0  ;;  %v534_v45 = vpop.f32.mrb[12].mxu1 }
 0x158   :  { %v422_v49 = vadd.f32 %v421_v44, %v4804_v19  ;;  %v423_v50 = vpop.f32.mrb[13].mxu0  ;;  %v535_v52 = vadd.f32 %v534_v45, %v4800_v17  ;;  %v536_v53 = vpop.f32.mrb[13].mxu1 }
 0x159   :  { %v424_v61 = vadd.f32 %v423_v50, %v4806_v21  ;;  %v425_v6 = vpop.f32.mrb[14].mxu0  ;;  %v537_v7 = vadd.f32 %v536_v53, %v4802_v18  ;;  %v538_v8 = vpop.f32.mrb[14].mxu1 }
 0x15a   :  { %v426_v9 = vadd.f32 %v425_v6, %v4804_v19  ;;  %v427_v10 = vpop.f32.mrb[15].mxu0  ;;  %v539_v11 = vadd.f32 %v538_v8, %v4800_v17  ;;  %v540_v16 = vpop.f32.mrb[15].mxu1 }
 0x15b   :  { %v428_v20 = vadd.f32 %v427_v10, %v4806_v21  ;;  %v541_v22 = vadd.f32 %v540_v16, %v4802_v18 }
 0x15c   :  { %v4864_v23 = vpack.c.bf16 %v426_v9, %v422_v49  ;;  %v4866_v24 = vpack.c.bf16 %v539_v11, %v535_v52 }
 0x15d   :  { %v4868_v25 = vpack.c.bf16 %v428_v20, %v424_v61  ;;  %v4870_v26 = vpack.c.bf16 %v541_v22, %v537_v7 }
 0x15f   :  { %5366 = vst [vmem:[#allocation18_spill] sm:$0xff] %v4868_v25  ;;  %5367 = vst [vmem:[#allocation19_spill] sm:$0xff] %v4870_v26  ;;  %v431_v27 = vpop.f32.mrb[16].mxu0  ;;  %v544_v28 = vpop.f32.mrb[16].mxu1 }
 0x160   :  { %v432_v29 = vadd.f32 %v431_v27, %v4804_v19  ;;  %v433_v30 = vpop.f32.mrb[17].mxu0  ;;  %v545_v31 = vadd.f32 %v544_v28, %v4800_v17  ;;  %v546_v32 = vpop.f32.mrb[17].mxu1 }
 0x161   :  { %v434_v33 = vadd.f32 %v433_v30, %v4806_v21  ;;  %v435_v34 = vpop.f32.mrb[18].mxu0  ;;  %v547_v35 = vadd.f32 %v546_v32, %v4802_v18  ;;  %v548_v44 = vpop.f32.mrb[18].mxu1 }
 0x162   :  { %v436_v45 = vadd.f32 %v435_v34, %v4804_v19  ;;  %v437_v49 = vpop.f32.mrb[19].mxu0  ;;  %v549_v50 = vadd.f32 %v548_v44, %v4800_v17  ;;  %v550_v52 = vpop.f32.mrb[19].mxu1 }
 0x163   :  { %v438_v53 = vadd.f32 %v437_v49, %v4806_v21  ;;  %v551_v61 = vadd.f32 %v550_v52, %v4802_v18 }
 0x164   :  { %v4880_v6 = vpack.c.bf16 %v436_v45, %v432_v29  ;;  %v4882_v7 = vpack.c.bf16 %v549_v50, %v545_v31 }
 0x165   :  { %v4884_v8 = vpack.c.bf16 %v438_v53, %v434_v33  ;;  %v4886_v9 = vpack.c.bf16 %v551_v61, %v547_v35 }
 0x166   :  { %5368 = vst [vmem:[#allocation20_spill] sm:$0xff] %v4880_v6  ;;  %5369 = vst [vmem:[#allocation21_spill] sm:$0xff] %v4882_v7 }
 0x167   :  { %5370 = vst [vmem:[#allocation22_spill] sm:$0xff] %v4884_v8  ;;  %5371 = vst [vmem:[#allocation23_spill] sm:$0xff] %v4886_v9  ;;  %v441_v10 = vpop.f32.mrb[20].mxu0  ;;  %v554_v11 = vpop.f32.mrb[20].mxu1  ;;  %v1661_v9 = vunpack.c.h.bf16 %v4854_v43 }
 0x168   :  { %v442_v16 = vadd.f32 %v441_v10, %v4804_v19  ;;  %v443_v20 = vpop.f32.mrb[21].mxu0  ;;  %v555_v22 = vadd.f32 %v554_v11, %v4800_v17  ;;  %v556_v27 = vpop.f32.mrb[21].mxu1 }
 0x169   :  { %v444_v28 = vadd.f32 %v443_v20, %v4806_v21  ;;  %v445_v30 = vpop.f32.mrb[22].mxu0  ;;  %v557_v29 = vadd.f32 %v556_v27, %v4802_v18  ;;  %v558_v32 = vpop.f32.mrb[22].mxu1 }
 0x16a   :  { %v446_v31 = vadd.f32 %v445_v30, %v4804_v19  ;;  %v447_v33 = vpop.f32.mrb[23].mxu0  ;;  %v559_v34 = vadd.f32 %v558_v32, %v4800_v17  ;;  %v560_v35 = vpop.f32.mrb[23].mxu1 }
 0x16b   :  { %v448_v44 = vadd.f32 %v447_v33, %v4806_v21  ;;  %v561_v45 = vadd.f32 %v560_v35, %v4802_v18 }
 0x16c   :  { %v4896_v49 = vpack.c.bf16 %v446_v31, %v442_v16  ;;  %v4898_v50 = vpack.c.bf16 %v559_v34, %v555_v22 }
 0x16d   :  { %v4900_v52 = vpack.c.bf16 %v448_v44, %v444_v28  ;;  %v4902_v53 = vpack.c.bf16 %v561_v45, %v557_v29 }
 0x16e   :  { %5372 = vst [vmem:[#allocation24_spill] sm:$0xff] %v4896_v49  ;;  %5373 = vst [vmem:[#allocation25_spill] sm:$0xff] %v4898_v50  ;;  %v1659_v49 = vunpack.c.h.bf16 %v4852_v42 }
 0x16f   :  { %5374 = vst [vmem:[#allocation26_spill] sm:$0xff] %v4900_v52  ;;  %5375 = vst [vmem:[#allocation27_spill] sm:$0xff] %v4902_v53  ;;  %v451_v61 = vpop.f32.mrb[24].mxu0  ;;  %v564_v10 = vpop.f32.mrb[24].mxu1 }
 0x170   :  { %v452_v11 = vadd.f32 %v451_v61, %v4804_v19  ;;  %v453_v20 = vpop.f32.mrb[25].mxu0  ;;  %v565_v27 = vadd.f32 %v564_v10, %v4800_v17  ;;  %v566_v30 = vpop.f32.mrb[25].mxu1 }
 0x171   :  { %v454_v32 = vadd.f32 %v453_v20, %v4806_v21  ;;  %v455_v33 = vpop.f32.mrb[26].mxu0  ;;  %v567_v16 = vadd.f32 %v566_v30, %v4802_v18  ;;  %v568_v31 = vpop.f32.mrb[26].mxu1 }
 0x172   :  { %v456_v22 = vadd.f32 %v455_v33, %v4804_v19  ;;  %v457_v28 = vpop.f32.mrb[27].mxu0  ;;  %v569_v29 = vadd.f32 %v568_v31, %v4800_v17  ;;  %v570_v34 = vpop.f32.mrb[27].mxu1 }
 0x173   :  { %v458_v35 = vadd.f32 %v457_v28, %v4806_v21  ;;  %v571_v44 = vadd.f32 %v570_v34, %v4802_v18 }
 0x174   :  { %v4912_v45 = vpack.c.bf16 %v456_v22, %v452_v11  ;;  %v4914_v61 = vpack.c.bf16 %v569_v29, %v565_v27 }
 0x175   :  { %v4916_v10 = vpack.c.bf16 %v458_v35, %v454_v32  ;;  %v4918_v20 = vpack.c.bf16 %v571_v44, %v567_v16 }
 0x176   :  { %5376 = vst [vmem:[#allocation28_spill] sm:$0xff] %v4912_v45  ;;  %5377 = vst [vmem:[#allocation29_spill] sm:$0xff] %v4914_v61 }
 0x177   :  { %5378 = vst [vmem:[#allocation30_spill] sm:$0xff] %v4916_v10  ;;  %5379 = vst [vmem:[#allocation31_spill] sm:$0xff] %v4918_v20  ;;  %v461_v30 = vpop.f32.mrb[28].mxu0  ;;  %v574_v0 = vpop.f32.mrb[28].mxu1 }
 0x178   :  { %v462_v33 = vadd.f32 %v461_v30, %v4804_v19  ;;  %v463_v53 = vpop.f32.mrb[29].mxu0  ;;  %v575_v31 = vadd.f32 %v574_v0, %v4800_v17  ;;  %v576_v52 = vpop.f32.mrb[29].mxu1 }
 0x179   :  { %v464_v28 = vadd.f32 %v463_v53, %v4806_v21  ;;  %v465_v50 = vpop.f32.mrb[30].mxu0  ;;  %v577_v11 = vadd.f32 %v576_v52, %v4802_v18  ;;  %v578_v22 = vpop.f32.mrb[30].mxu1  ;;  %v935_v52 = vunpack.c.l.bf16 %v4816_v37 }
 0x17a   :  { %v466_v27 = vadd.f32 %v465_v50, %v4804_v19  ;;  %v467_v32 = vpop.f32.mrb[31].mxu0  ;;  %v579_v16 = vadd.f32 %v578_v22, %v4800_v17  ;;  %v580_v29 = vpop.f32.mrb[31].mxu1  ;;  %v937_v19 = vunpack.c.l.bf16 %v4818_v38  ;;  %v936_v17 = vunpack.c.l.bf16 %v4820_v39 }
 0x17b   :  { %v468_v34 = vadd.f32 %v467_v32, %v4806_v21  ;;  %v581_v35 = vadd.f32 %v580_v29, %v4802_v18  ;;  %v938_v21 = vunpack.c.l.bf16 %v4822_v40 }
 0x17c   :  { %v4928_v44 = vpack.c.bf16 %v466_v27, %v462_v33  ;;  %v4930_v0 = vpack.c.bf16 %v579_v16, %v575_v31  ;;  %v939_v31 = vunpack.c.h.bf16 %v4816_v37 }
 0x17d   :  { %v4932_v30 = vpack.c.bf16 %v468_v34, %v464_v28  ;;  %v4934_v53 = vpack.c.bf16 %v581_v35, %v577_v11  ;;  %v941_v28 = vunpack.c.h.bf16 %v4818_v38  ;;  %v940_v34 = vunpack.c.h.bf16 %v4820_v39 }
 0x17e   :  { %5380 = vst [vmem:[#allocation32_spill] sm:$0xff] %v4928_v44  ;;  %5381 = vst [vmem:[#allocation33_spill] sm:$0xff] %v4930_v0  ;;  %v942_v35 = vunpack.c.h.bf16 %v4822_v40 }
 0x17f   :  { %5382 = vst [vmem:[#allocation34_spill] sm:$0xff] %v4932_v30  ;;  %5383 = vst [vmem:[#allocation35_spill] sm:$0xff] %v4934_v53  ;;  %v883_v50 = vpop.f32.mrb[32].mxu0  ;;  %v926_v20 = vpop.f32.mrb[32].mxu1 }
 0x180   :  { %v943_v22 = vadd.f32 %v935_v52, %v883_v50  ;;  %v945_v18 = vadd.f32 %v937_v19, %v926_v20  ;;  %v885_v33 = vpop.f32.mrb[33].mxu0  ;;  %v928_v27 = vpop.f32.mrb[33].mxu1 }
 0x181   :  { %v944_v11 = vadd.f32 %v936_v17, %v885_v33  ;;  %v946_v32 = vadd.f32 %v938_v21, %v928_v27  ;;  %v887_v16 = vpop.f32.mrb[34].mxu0  ;;  %v930_v29 = vpop.f32.mrb[34].mxu1 }
 0x182   :  { %v3630_v53 = vmul.f32 -1.442695, %v943_v22  ;;  %v947_v30 = vadd.f32 %v939_v31, %v887_v16  ;;  %v949_v0 = vadd.f32 %v941_v28, %v930_v29  ;;  %v889_v44 = vpop.f32.mrb[35].mxu0  ;;  %v932_v52 = vpop.f32.mrb[35].mxu1  ;;  %v3632_v38 = vmul.f32 -1.442695, %v945_v18 }
 0x183   :  { %v3631_v20 = vmul.f32 -1.442695, %v944_v11  ;;  %v948_v19 = vadd.f32 %v940_v34, %v889_v44  ;;  %v950_v50 = vadd.f32 %v942_v35, %v932_v52 }
 0x184   :  { %4184 = vpow2.f32 %v3630_v53  ;;  %v3633_v37 = vmul.f32 -1.442695, %v947_v30  ;;  %v3635_v17 = vmul.f32 -1.442695, %v949_v0 }
 0x185   :  { %v3634_v10 = vmul.f32 -1.442695, %v948_v19  ;;  %4186 = vpow2.f32 %v3631_v20 }
 0x186   :  { %4188 = vpow2.f32 %v3633_v37 }
 0x187   :  { %4190 = vpow2.f32 %v3634_v10 }
 0x188   :  { %4192 = vtanh.f32 %v946_v32 }
 0x189   :  { %4194 = vpow2.f32 %v3632_v38 }
 0x18a   :  { %4196 = vpow2.f32 %v3635_v17 }
 0x18e   :  { %v4185_v21 = vpop.eup %4184 }
 0x18f   :  { %v969_v39 = vadd.f32 1.0, %v4185_v21  ;;  %v4187_v40 = vpop.eup %4186 }
 0x190   :  { %v4189_v22 = vpop.eup %4188  ;;  %v970_v33 = vadd.f32 1.0, %v4187_v40 }
 0x191   :  { %4198 = vrcp.f32 %v969_v39  ;;  %v972_v27 = vadd.f32 1.0, %v4189_v22  ;;  %v4191_v44 = vpop.eup %4190 }
 0x192   :  { %4200 = vtanh.f32 %v950_v50  ;;  %v973_v30 = vadd.f32 1.0, %v4191_v44  ;;  %v4193_v53 = vpop.eup %4192  ;;  %v4954_v44 = vld [vmem:[#allocation10 + $0xc] ss:$16 sps:$4 sm:$0xff]  }
 0x193   :  { %4202 = vrcp.f32 %v970_v33  ;;  %v4195_v10 = vpop.eup %4194  ;;  %v5384_v33 = vmov 0   ;;  %1611 = vmatprep.subr.bf16.mxu1 %v4954_v44 }
 0x194   :  { %4204 = vrcp.f32 %v972_v27  ;;  %v4197_v18 = vpop.eup %4196  ;;  %v971_v16 = vadd.f32 1.0, %v4195_v10  ;;  %v4952_v27 = vld [vmem:[#allocation10 + $0x4] ss:$16 sps:$4 sm:$0xff]  }
 0x195   :  { %4206 = vrcp.f32 %v973_v30  ;;  %v974_v20 = vadd.f32 1.0, %v4197_v18  ;;  %v4956_v30 = vld [vmem:[#allocation10] ss:$16 sps:$4 sm:$0xff]   ;;  %1568 = vmatprep.subr.bf16.mxu0 %v4952_v27  ;;  %v4964_v10 = vld [vmem:[#allocation10 + $0x24] ss:$16 sps:$4 sm:$0xff]  }
 0x196   :  { %4208 = vrcp.f32 %v971_v16  ;;  %v4966_v18 = vld [vmem:[#allocation10 + $0x2c] ss:$16 sps:$4 sm:$0xff]   ;;  %v4987_v16 = vld [vmem:[#allocation10 + $0x60] ss:$16 sps:$4 sm:$0xff]  }
 0x19b   :  { %v4199_v0 = vpop.eup %4198 }
 0x19c   :  { %v4201_v31 = vpop.eup %4200  ;;  %v991_v28 = vmul.f32 %v4199_v0, %v4193_v53  ;;  %v4958_v53 = vld [vmem:[#allocation10 + $0x8] ss:$16 sps:$4 sm:$0xff]   ;;  %v4968_v0 = vld [vmem:[#allocation10 + $0x20] ss:$16 sps:$4 sm:$0xff]  }
 0x19d   :  { %v4203_v11 = vpop.eup %4202 }
 0x19e   :  { %v4205_v32 = vpop.eup %4204  ;;  %v989_v29 = vmul.f32 0.0, %v4203_v11  ;;  %v4979_v11 = vld [vmem:[#allocation10 + $0x40] ss:$16 sps:$4 sm:$0xff]  }
 0x19f   :  { %v992_v34 = vmul.f32 %v4205_v32, %v4201_v31  ;;  %v4207_v35 = vpop.eup %4206  ;;  %v4970_v31 = vld [vmem:[#allocation10 + $0x28] ss:$16 sps:$4 sm:$0xff]   ;;  %v4984_v32 = vld [vmem:[#allocation10 + $0x64] ss:$16 sps:$4 sm:$0xff]  }
 0x1a0   :  { %v4944_v52 = vadd.f32 %v991_v28, %v989_v29  ;;  %v990_v19 = vmul.f32 0.0, %v4207_v35  ;;  %v4209_v37 = vpop.eup %4208  ;;  %v4976_v28 = vld [vmem:[#allocation10 + $0x44] ss:$16 sps:$4 sm:$0xff]  }
 0x1a1   :  { %v4994_v29 = vld [vmem:[#allocation10 + $0x84] ss:$16 sps:$4 sm:$0xff]  }
 0x1a2   :  { %4210 = vtanh.f32 %v4944_v52  ;;  %v4947_v50 = vadd.f32 %v992_v34, %v990_v19  ;;  %v1301_v34 = vunpack.c.h.bf16 %v4838_v15 }
 0x1a3   :  { %4212 = vrcp.f32 %v974_v20 }
 0x1a4   :  { %4214 = vtanh.f32 %v4947_v50 }
 0x1ac   :  { %v4211_v38 = vpop.eup %4210 }
 0x1ad   :  { %v4213_v17 = vpop.eup %4212  ;;  %v997_v39 = vmul.f32 %v4211_v38, %v4209_v37 }
 0x1ae   :  { %v4215_v21 = vpop.eup %4214 }
 0x1af   :  { %v998_v40 = vmul.f32 %v4215_v21, %v4213_v17 }
 0x1b1   :  { %v999_v22 = vpack.c.bf16 %v998_v40, %v997_v39 }
 0x1b3   :  { %3938 = vst [vmem:[#allocation13] sm:$0xff] %v999_v22   ;;  %1241 = vmatmul.mubr.bf16.vlgmr.msra.gmra.mrb[36].mxu0 %v999_v22  ;;  %1284 = vmatmul.mubr.bf16.vlgmr.msra.gmra.mrb[36].mxu1 %v999_v22 }
 0x1b4   :  { %1600 = vmatprep.mubr.bf16.mxu0 %v5384_v33  ;;  %1643 = vmatprep.mubr.bf16.mxu1 %v5384_v33 }
 0x1b5   :  { %1569 = vmatpush1.bf16.msra.mxu0 %v4956_v30  ;;  %1612 = vmatpush1.bf16.msra.mxu1 %v4958_v53 }
 0x1b6   :  { %1570 = vmatprep.subr.bf16.mxu0 %v4964_v10  ;;  %1613 = vmatprep.subr.bf16.mxu1 %v4966_v18 }
 0x1b9   :  { %1571 = vmatpush1.bf16.msra.mxu0 %v4968_v0  ;;  %1614 = vmatpush1.bf16.msra.mxu1 %v4970_v31 }
 0x1ba   :  { %1615 = vmatprep.subr.bf16.mxu1 %v4684_v46  ;;  %1572 = vmatprep.subr.bf16.mxu0 %v4976_v28  ;;  %v4992_v46 = vld [vmem:[#allocation10 + $0x80] ss:$16 sps:$4 sm:$0xff]  }
 0x1bd   :  { %1573 = vmatpush1.bf16.msra.mxu0 %v4979_v11  ;;  %1616 = vmatpush1.bf16.msra.mxu1 %v4687_v47  ;;  %v1294_v47 = vunpack.c.l.bf16 %v4832_v12 }
 0x1be   :  { %1617 = vmatprep.subr.bf16.mxu1 %v4689_v48  ;;  %1574 = vmatprep.subr.bf16.mxu0 %v4984_v32  ;;  %v1296_v48 = vunpack.c.l.bf16 %v4834_v13 }
 0x1c1   :  { %1575 = vmatpush1.bf16.msra.mxu0 %v4987_v16  ;;  %1618 = vmatpush1.bf16.msra.mxu1 %v4701_v51 }
 0x1c2   :  { %1619 = vmatprep.subr.bf16.mxu1 %v4707_v54  ;;  %1576 = vmatprep.subr.bf16.mxu0 %v4994_v29 }
 0x1c5   :  { %1577 = vmatpush1.bf16.msra.mxu0 %v4992_v46  ;;  %1620 = vmatpush1.bf16.msra.mxu1 %v4713_v56  ;;  %v1297_v56 = vunpack.c.l.bf16 %v4838_v15 }
 0x1c6   :  { %1578 = vmatprep.subr.bf16.mxu0 %v4710_v55  ;;  %1621 = vmatprep.subr.bf16.mxu1 %v4715_v57  ;;  %v1295_v55 = vunpack.c.l.bf16 %v4836_v14 }
 0x1c9   :  { %1579 = vmatpush1.bf16.msra.mxu0 %v4717_v58  ;;  %1622 = vmatpush1.bf16.msra.mxu1 %v4723_v60 }
 0x1ca   :  { %1580 = vmatprep.subr.bf16.mxu0 %v4721_v59  ;;  %1623 = vmatprep.subr.bf16.mxu1 %v4732_v63  ;;  %v1300_v63 = vunpack.c.h.bf16 %v4834_v13 }
 0x1cd   :  { %1581 = vmatpush1.bf16.msra.mxu0 %v4729_v62  ;;  %1624 = vmatpush1.bf16.msra.mxu1 %v4736_v2  ;;  %v1298_v62 = vunpack.c.h.bf16 %v4832_v12 }
 0x1ce   :  { %1582 = vmatprep.subr.bf16.mxu0 %v4734_v1  ;;  %1625 = vmatprep.subr.bf16.mxu1 %v4739_v3 }
 0x1d1   :  { %1583 = vmatpush1.bf16.msra.mxu0 %v4743_v4  ;;  %1626 = vmatpush1.bf16.msra.mxu1 %v4747_v5  ;;  %v1299_v5 = vunpack.c.h.bf16 %v4836_v14 }
 0x1d2   :  { %1928 = vmatprep.subr.bf16.mxu0 %v4952_v27  ;;  %1971 = vmatprep.subr.bf16.mxu1 %v4954_v44 }
 0x286   :  { %v1242_v51 = vpop.f32.mrb[36].mxu0  ;;  %v1285_v54 = vpop.f32.mrb[36].mxu1 }
 0x287   :  { %v1302_v57 = vadd.f32 %v1294_v47, %v1242_v51  ;;  %v1304_v58 = vadd.f32 %v1296_v48, %v1285_v54  ;;  %v1244_v59 = vpop.f32.mrb[37].mxu0  ;;  %v1287_v60 = vpop.f32.mrb[37].mxu1 }
 0x288   :  { %v1303_v1 = vadd.f32 %v1295_v55, %v1244_v59  ;;  %v1305_v2 = vadd.f32 %v1297_v56, %v1287_v60  ;;  %v1246_v3 = vpop.f32.mrb[38].mxu0  ;;  %v1289_v4 = vpop.f32.mrb[38].mxu1 }
 0x289   :  { %v3670_v35 = vmul.f32 -1.442695, %v1302_v57  ;;  %v1306_v20 = vadd.f32 %v1298_v62, %v1246_v3  ;;  %v1308_v19 = vadd.f32 %v1300_v63, %v1289_v4  ;;  %v1248_v37 = vpop.f32.mrb[39].mxu0  ;;  %v1291_v38 = vpop.f32.mrb[39].mxu1  ;;  %v3672_v13 = vmul.f32 -1.442695, %v1304_v58 }
 0x28a   :  { %v3671_v17 = vmul.f32 -1.442695, %v1303_v1  ;;  %v1307_v21 = vadd.f32 %v1299_v5, %v1248_v37  ;;  %v1309_v39 = vadd.f32 %v1301_v34, %v1291_v38 }
 0x28b   :  { %4216 = vpow2.f32 %v3670_v35  ;;  %v3673_v12 = vmul.f32 -1.442695, %v1306_v20  ;;  %v3675_v22 = vmul.f32 -1.442695, %v1308_v19 }
 0x28c   :  { %v3674_v40 = vmul.f32 -1.442695, %v1307_v21  ;;  %4218 = vpow2.f32 %v3671_v17 }
 0x28d   :  { %4220 = vpow2.f32 %v3673_v12 }
 0x28e   :  { %4222 = vpow2.f32 %v3674_v40 }
 0x28f   :  { %4224 = vtanh.f32 %v1305_v2 }
 0x290   :  { %4226 = vpow2.f32 %v3672_v13  ;;  %v5046_v13 = vld [vmem:[#allocation10 + $0x48] ss:$16 sps:$4 sm:$0xff]  }
 0x291   :  { %4228 = vpow2.f32 %v3675_v22  ;;  %v5050_v22 = vld [vmem:[#allocation10 + $0x6c] ss:$16 sps:$4 sm:$0xff]  }
 0x295   :  { %v4217_v47 = vpop.eup %4216 }
 0x296   :  { %v1328_v14 = vadd.f32 1.0, %v4217_v47  ;;  %v4219_v15 = vpop.eup %4218  ;;  %v5052_v47 = vld [vmem:[#allocation10 + $0x68] ss:$16 sps:$4 sm:$0xff]  }
 0x297   :  { %v4221_v48 = vpop.eup %4220  ;;  %v1329_v51 = vadd.f32 1.0, %v4219_v15  ;;  %v5058_v15 = vld [vmem:[#allocation10 + $0x8c] ss:$16 sps:$4 sm:$0xff]  }
 0x298   :  { %4230 = vrcp.f32 %v1328_v14  ;;  %v1331_v54 = vadd.f32 1.0, %v4221_v48  ;;  %v4223_v55 = vpop.eup %4222  ;;  %v5056_v14 = vld [vmem:[#allocation10 + $0x88] ss:$16 sps:$4 sm:$0xff]   ;;  %v5060_v48 = vld [vmem:[#allocation10 + $0xa0] ss:$16 sps:$4 sm:$0xff]  }
 0x299   :  { %4232 = vtanh.f32 %v1309_v39  ;;  %v1332_v56 = vadd.f32 1.0, %v4223_v55  ;;  %v4225_v57 = vpop.eup %4224  ;;  %v5067_v55 = vld [vmem:[#allocation10 + $0xc4] ss:$16 sps:$4 sm:$0xff]  }
 0x29a   :  { %4234 = vrcp.f32 %v1329_v51  ;;  %v4227_v59 = vpop.eup %4226  ;;  %v5062_v51 = vld [vmem:[#allocation10 + $0xa4] ss:$16 sps:$4 sm:$0xff]  }
 0x29b   :  { %4236 = vrcp.f32 %v1331_v54  ;;  %v4229_v58 = vpop.eup %4228  ;;  %v1330_v3 = vadd.f32 1.0, %v4227_v59  ;;  %v5064_v54 = vld [vmem:[#allocation10 + $0xac] ss:$16 sps:$4 sm:$0xff]  }
 0x29c   :  { %4238 = vrcp.f32 %v1332_v56  ;;  %v1333_v20 = vadd.f32 1.0, %v4229_v58  ;;  %v5071_v56 = vld [vmem:[#allocation10 + $0xa8] ss:$16 sps:$4 sm:$0xff]   ;;  %v5077_v59 = vld [vmem:[#allocation10 + $0xcc] ss:$16 sps:$4 sm:$0xff]  }
 0x29d   :  { %4240 = vrcp.f32 %v1330_v3  ;;  %v5080_v58 = vld [vmem:[#allocation10 + $0xe4] ss:$16 sps:$4 sm:$0xff]   ;;  %v1656_v3 = vunpack.c.l.bf16 %v4850_v41 }
 0x2a2   :  { %v4231_v60 = vpop.eup %4230 }
 0x2a3   :  { %v4233_v62 = vpop.eup %4232  ;;  %v1350_v63 = vmul.f32 %v4231_v60, %v4225_v57  ;;  %v5075_v57 = vld [vmem:[#allocation10 + $0xc0] ss:$16 sps:$4 sm:$0xff]   ;;  %v5083_v60 = vld [vmem:[#allocation10 + $0xc8] ss:$16 sps:$4 sm:$0xff]  }
 0x2a4   :  { %v4235_v1 = vpop.eup %4234 }
 0x2a5   :  { %v4237_v2 = vpop.eup %4236  ;;  %v1348_v4 = vmul.f32 %v4235_v1, %v4944_v52  ;;  %v5093_v1 = vld [vmem:[#allocation10 + $0xe8] ss:$16 sps:$4 sm:$0xff]  }
 0x2a6   :  { %v1351_v5 = vmul.f32 %v4237_v2, %v4233_v62  ;;  %v4239_v34 = vpop.eup %4238  ;;  %v5087_v62 = vld [vmem:[#allocation10 + $0xe0] ss:$16 sps:$4 sm:$0xff]   ;;  %v1654_v2 = vunpack.c.l.bf16 %v4848_v36 }
 0x2a7   :  { %v5023_v35 = vadd.f32 %v1350_v63, %v1348_v4  ;;  %v1349_v19 = vmul.f32 %v4239_v34, %v4947_v50  ;;  %v4241_v38 = vpop.eup %4240  ;;  %v5044_v50 = vld [vmem:[#allocation10 + $0x4c] ss:$16 sps:$4 sm:$0xff]   ;;  %v1655_v34 = vunpack.c.l.bf16 %v4852_v42 }
 0x2a8   :  { %v5089_v63 = vld [vmem:[#allocation10 + $0xec] ss:$16 sps:$4 sm:$0xff]  }
 0x2a9   :  { %4242 = vtanh.f32 %v5023_v35  ;;  %v5027_v37 = vadd.f32 %v1351_v5, %v1349_v19 }
 0x2aa   :  { %4244 = vrcp.f32 %v1333_v20  ;;  %v1657_v20 = vunpack.c.l.bf16 %v4854_v43 }
 0x2ab   :  { %4246 = vtanh.f32 %v5027_v37 }
 0x2b3   :  { %v4243_v17 = vpop.eup %4242 }
 0x2b4   :  { %v4245_v21 = vpop.eup %4244  ;;  %v1356_v52 = vmul.f32 %v4243_v17, %v4241_v38 }
 0x2b5   :  { %v4247_v39 = vpop.eup %4246 }
 0x2b6   :  { %v1357_v12 = vmul.f32 %v4247_v39, %v4245_v21  ;;  %v1658_v39 = vunpack.c.h.bf16 %v4848_v36 }
 0x2b8   :  { %v1358_v40 = vpack.c.bf16 %v1357_v12, %v1356_v52  ;;  %v1660_v52 = vunpack.c.h.bf16 %v4850_v41 }
 0x2ba   :  { %3943 = vst [vmem:[#allocation13 + $0x8] sm:$0xff] %v1358_v40   ;;  %1601 = vmatmul.mubr.bf16.vlgmr.msra.gmra.mrb[40].mxu0 %v1358_v40  ;;  %1644 = vmatmul.mubr.bf16.vlgmr.msra.gmra.mrb[40].mxu1 %v1358_v40 }
 0x2bb   :  { %1929 = vmatpush1.bf16.msra.mxu0 %v4956_v30  ;;  %1972 = vmatpush1.bf16.msra.mxu1 %v4958_v53 }
 0x2bc   :  { %1930 = vmatprep.subr.bf16.mxu0 %v4964_v10  ;;  %1973 = vmatprep.subr.bf16.mxu1 %v4966_v18 }
 0x2bd   :  { %1960 = vmatprep.mubr.bf16.mxu0 %v5384_v33  ;;  %2003 = vmatprep.mubr.bf16.mxu1 %v5384_v33 }
 0x2bf   :  { %1931 = vmatpush1.bf16.msra.mxu0 %v4968_v0  ;;  %1974 = vmatpush1.bf16.msra.mxu1 %v4970_v31 }
 0x2c0   :  { %1932 = vmatprep.subr.bf16.mxu0 %v4976_v28  ;;  %1975 = vmatprep.subr.bf16.mxu1 %v5044_v50 }
 0x2c3   :  { %1933 = vmatpush1.bf16.msra.mxu0 %v4979_v11  ;;  %1976 = vmatpush1.bf16.msra.mxu1 %v5046_v13 }
 0x2c4   :  { %1934 = vmatprep.subr.bf16.mxu0 %v4984_v32  ;;  %1977 = vmatprep.subr.bf16.mxu1 %v5050_v22 }
 0x2c7   :  { %1935 = vmatpush1.bf16.msra.mxu0 %v4987_v16  ;;  %1978 = vmatpush1.bf16.msra.mxu1 %v5052_v47 }
 0x2c8   :  { %1936 = vmatprep.subr.bf16.mxu0 %v4994_v29  ;;  %1979 = vmatprep.subr.bf16.mxu1 %v5058_v15 }
 0x2cb   :  { %1937 = vmatpush1.bf16.msra.mxu0 %v4992_v46  ;;  %1980 = vmatpush1.bf16.msra.mxu1 %v5056_v14 }
 0x2cc   :  { %1938 = vmatprep.subr.bf16.mxu0 %v5062_v51  ;;  %1981 = vmatprep.subr.bf16.mxu1 %v5064_v54 }
 0x2cf   :  { %1939 = vmatpush1.bf16.msra.mxu0 %v5060_v48  ;;  %1982 = vmatpush1.bf16.msra.mxu1 %v5071_v56 }
 0x2d0   :  { %1940 = vmatprep.subr.bf16.mxu0 %v5067_v55  ;;  %1983 = vmatprep.subr.bf16.mxu1 %v5077_v59 }
 0x2d3   :  { %1941 = vmatpush1.bf16.msra.mxu0 %v5075_v57  ;;  %1984 = vmatpush1.bf16.msra.mxu1 %v5083_v60 }
 0x2d4   :  { %1942 = vmatprep.subr.bf16.mxu0 %v5080_v58  ;;  %1985 = vmatprep.subr.bf16.mxu1 %v5089_v63 }
 0x2d7   :  { %1943 = vmatpush1.bf16.msra.mxu0 %v5087_v62  ;;  %1986 = vmatpush1.bf16.msra.mxu1 %v5093_v1 }
 0x2d8   :  { %2288 = vmatprep.subr.bf16.mxu0 %v4952_v27  ;;  %2331 = vmatprep.subr.bf16.mxu1 %v4954_v44 }
 0x38d   :  { %v1602_v4 = vpop.f32.mrb[40].mxu0  ;;  %v1645_v5 = vpop.f32.mrb[40].mxu1 }
 0x38e   :  { %v1662_v19 = vadd.f32 %v1654_v2, %v1602_v4  ;;  %v1664_v38 = vadd.f32 %v1656_v3, %v1645_v5  ;;  %v1604_v17 = vpop.f32.mrb[41].mxu0  ;;  %v1647_v21 = vpop.f32.mrb[41].mxu1 }
 0x38f   :  { %v1663_v12 = vadd.f32 %v1655_v34, %v1604_v17  ;;  %v1665_v40 = vadd.f32 %v1657_v20, %v1647_v21  ;;  %v1606_v61 = vpop.f32.mrb[42].mxu0  ;;  %v1649_v45 = vpop.f32.mrb[42].mxu1 }
 0x390   :  { %v3710_v8 = vmul.f32 -1.442695, %v1662_v19  ;;  %v1666_v7 = vadd.f32 %v1658_v39, %v1606_v61  ;;  %v1668_v6 = vadd.f32 %v1660_v52, %v1649_v45  ;;  %v1608_v26 = vpop.f32.mrb[43].mxu0  ;;  %v1651_v2 = vpop.f32.mrb[43].mxu1  ;;  %v3712_v41 = vmul.f32 -1.442695, %v1664_v38 }
 0x391   :  { %v3711_v3 = vmul.f32 -1.442695, %v1663_v12  ;;  %v1667_v4 = vadd.f32 %v1659_v49, %v1608_v26  ;;  %v1669_v5 = vadd.f32 %v1661_v9, %v1651_v2 }
 0x392   :  { %4248 = vpow2.f32 %v3710_v8  ;;  %v3713_v36 = vmul.f32 -1.442695, %v1666_v7  ;;  %v3715_v34 = vmul.f32 -1.442695, %v1668_v6 }
 0x393   :  { %v3714_v25 = vmul.f32 -1.442695, %v1667_v4  ;;  %4250 = vpow2.f32 %v3711_v3 }
 0x394   :  { %4252 = vpow2.f32 %v3713_v36 }
 0x395   :  { %4254 = vpow2.f32 %v3714_v25 }
 0x396   :  { %4256 = vtanh.f32 %v1665_v40 }
 0x397   :  { %4258 = vpow2.f32 %v3712_v41 }
 0x398   :  { %4260 = vpow2.f32 %v3715_v34 }
 0x39c   :  { %v4249_v20 = vpop.eup %4248 }
 0x39d   :  { %v1688_v42 = vadd.f32 1.0, %v4249_v20  ;;  %v4251_v43 = vpop.eup %4250 }
 0x39e   :  { %v4253_v45 = vpop.eup %4252  ;;  %v1689_v61 = vadd.f32 1.0, %v4251_v43 }
 0x39f   :  { %4262 = vrcp.f32 %v1688_v42  ;;  %v1691_v19 = vadd.f32 1.0, %v4253_v45  ;;  %v4255_v26 = vpop.eup %4254  ;;  %v2016_v45 = vunpack.c.l.bf16 %v4866_v24 }
 0x3a0   :  { %4264 = vtanh.f32 %v1669_v5  ;;  %v1692_v7 = vadd.f32 1.0, %v4255_v26  ;;  %v4257_v8 = vpop.eup %4256  ;;  %v5385_v26 = vld [vmem:[#allocation18_spill] sm:$0xff] }
 0x3a1   :  { %4266 = vrcp.f32 %v1689_v61  ;;  %v4259_v25 = vpop.eup %4258 }
 0x3a2   :  { %4268 = vrcp.f32 %v1691_v19  ;;  %v4261_v9 = vpop.eup %4260  ;;  %v1690_v39 = vadd.f32 1.0, %v4259_v25 }
 0x3a3   :  { %4270 = vrcp.f32 %v1692_v7  ;;  %v1693_v3 = vadd.f32 1.0, %v4261_v9  ;;  %v2015_v7 = vunpack.c.l.bf16 %v5385_v26 }
 0x3a4   :  { %4272 = vrcp.f32 %v1690_v39 }
 0x3a9   :  { %v4263_v6 = vpop.eup %4262 }
 0x3aa   :  { %v4265_v49 = vpop.eup %4264  ;;  %v1710_v38 = vmul.f32 %v4263_v6, %v4257_v8  ;;  %v5386_v8 = vld [vmem:[#allocation19_spill] sm:$0xff] }
 0x3ab   :  { %v4267_v17 = vpop.eup %4266  ;;  %v2017_v25 = vunpack.c.l.bf16 %v5386_v8 }
 0x3ac   :  { %v4269_v21 = vpop.eup %4268  ;;  %v1708_v52 = vmul.f32 %v4267_v17, %v5023_v35  ;;  %v2018_v17 = vunpack.c.h.bf16 %v4864_v23 }
 0x3ad   :  { %v1711_v12 = vmul.f32 %v4269_v21, %v4265_v49  ;;  %v4271_v40 = vpop.eup %4270 }
 0x3ae   :  { %v5109_v2 = vadd.f32 %v1710_v38, %v1708_v52  ;;  %v1709_v4 = vmul.f32 %v4271_v40, %v5027_v37  ;;  %v4273_v36 = vpop.eup %4272  ;;  %v2014_v37 = vunpack.c.l.bf16 %v4864_v23  ;;  %v2021_v40 = vunpack.c.h.bf16 %v5386_v8 }
 0x3b0   :  { %4274 = vtanh.f32 %v5109_v2  ;;  %v5113_v5 = vadd.f32 %v1711_v12, %v1709_v4  ;;  %v2019_v12 = vunpack.c.h.bf16 %v5385_v26 }
 0x3b1   :  { %4276 = vrcp.f32 %v1693_v3 }
 0x3b2   :  { %4278 = vtanh.f32 %v5113_v5 }
 0x3ba   :  { %v4275_v41 = vpop.eup %4274 }
 0x3bb   :  { %v4277_v34 = vpop.eup %4276  ;;  %v1716_v35 = vmul.f32 %v4275_v41, %v4273_v36 }
 0x3bc   :  { %v4279_v20 = vpop.eup %4278 }
 0x3bd   :  { %v1717_v42 = vmul.f32 %v4279_v20, %v4277_v34 }
 0x3bf   :  { %v1718_v43 = vpack.c.bf16 %v1717_v42, %v1716_v35 }
 0x3c1   :  { %3948 = vst [vmem:[#allocation13 + $0x10] sm:$0xff] %v1718_v43   ;;  %1961 = vmatmul.mubr.bf16.vlgmr.msra.gmra.mrb[44].mxu0 %v1718_v43  ;;  %2004 = vmatmul.mubr.bf16.vlgmr.msra.gmra.mrb[44].mxu1 %v1718_v43 }
 0x3c2   :  { %2289 = vmatpush1.bf16.msra.mxu0 %v4956_v30  ;;  %2332 = vmatpush1.bf16.msra.mxu1 %v4958_v53 }
 0x3c3   :  { %2290 = vmatprep.subr.bf16.mxu0 %v4964_v10  ;;  %2333 = vmatprep.subr.bf16.mxu1 %v4966_v18 }
 0x3c4   :  { %2320 = vmatprep.mubr.bf16.mxu0 %v5384_v33  ;;  %2363 = vmatprep.mubr.bf16.mxu1 %v5384_v33 }
 0x3c6   :  { %2291 = vmatpush1.bf16.msra.mxu0 %v4968_v0  ;;  %2334 = vmatpush1.bf16.msra.mxu1 %v4970_v31 }
 0x3c7   :  { %2292 = vmatprep.subr.bf16.mxu0 %v4976_v28  ;;  %2335 = vmatprep.subr.bf16.mxu1 %v5044_v50 }
 0x3ca   :  { %2293 = vmatpush1.bf16.msra.mxu0 %v4979_v11  ;;  %2336 = vmatpush1.bf16.msra.mxu1 %v5046_v13 }
 0x3cb   :  { %2294 = vmatprep.subr.bf16.mxu0 %v4984_v32  ;;  %2337 = vmatprep.subr.bf16.mxu1 %v5050_v22 }
 0x3ce   :  { %2295 = vmatpush1.bf16.msra.mxu0 %v4987_v16  ;;  %2338 = vmatpush1.bf16.msra.mxu1 %v5052_v47 }
 0x3cf   :  { %2296 = vmatprep.subr.bf16.mxu0 %v4994_v29  ;;  %2339 = vmatprep.subr.bf16.mxu1 %v5058_v15 }
 0x3d2   :  { %2297 = vmatpush1.bf16.msra.mxu0 %v4992_v46  ;;  %2340 = vmatpush1.bf16.msra.mxu1 %v5056_v14 }
 0x3d3   :  { %2298 = vmatprep.subr.bf16.mxu0 %v5062_v51  ;;  %2341 = vmatprep.subr.bf16.mxu1 %v5064_v54 }
 0x3d6   :  { %2299 = vmatpush1.bf16.msra.mxu0 %v5060_v48  ;;  %2342 = vmatpush1.bf16.msra.mxu1 %v5071_v56 }
 0x3d7   :  { %2300 = vmatprep.subr.bf16.mxu0 %v5067_v55  ;;  %2343 = vmatprep.subr.bf16.mxu1 %v5077_v59 }
 0x3da   :  { %2301 = vmatpush1.bf16.msra.mxu0 %v5075_v57  ;;  %2344 = vmatpush1.bf16.msra.mxu1 %v5083_v60 }
 0x3db   :  { %2302 = vmatprep.subr.bf16.mxu0 %v5080_v58  ;;  %2345 = vmatprep.subr.bf16.mxu1 %v5089_v63 }
 0x3de   :  { %2303 = vmatpush1.bf16.msra.mxu0 %v5087_v62  ;;  %2346 = vmatpush1.bf16.msra.mxu1 %v5093_v1 }
 0x3df   :  { %2648 = vmatprep.subr.bf16.mxu0 %v4952_v27  ;;  %2691 = vmatprep.subr.bf16.mxu1 %v4954_v44  ;;  %v2020_v27 = vunpack.c.h.bf16 %v4866_v24 }
 0x494   :  { %v1962_v61 = vpop.f32.mrb[44].mxu0  ;;  %v2005_v19 = vpop.f32.mrb[44].mxu1 }
 0x495   :  { %v2022_v9 = vadd.f32 %v2014_v37, %v1962_v61  ;;  %v2024_v6 = vadd.f32 %v2016_v45, %v2005_v19  ;;  %v1964_v49 = vpop.f32.mrb[45].mxu0  ;;  %v2007_v38 = vpop.f32.mrb[45].mxu1 }
 0x496   :  { %v2023_v21 = vadd.f32 %v2015_v7, %v1964_v49  ;;  %v2025_v44 = vadd.f32 %v2017_v25, %v2007_v38  ;;  %v1966_v39 = vpop.f32.mrb[46].mxu0  ;;  %v2009_v52 = vpop.f32.mrb[46].mxu1 }
 0x497   :  { %v3750_v3 = vmul.f32 -1.442695, %v2022_v9  ;;  %v2026_v4 = vadd.f32 %v2018_v17, %v1966_v39  ;;  %v2028_v36 = vadd.f32 %v2020_v27, %v2009_v52  ;;  %v1968_v41 = vpop.f32.mrb[47].mxu0  ;;  %v2011_v34 = vpop.f32.mrb[47].mxu1  ;;  %v3752_v24 = vmul.f32 -1.442695, %v2024_v6 }
 0x498   :  { %v3751_v20 = vmul.f32 -1.442695, %v2023_v21  ;;  %v2027_v35 = vadd.f32 %v2019_v12, %v1968_v41  ;;  %v2029_v42 = vadd.f32 %v2021_v40, %v2011_v34 }
 0x499   :  { %4280 = vpow2.f32 %v3750_v3  ;;  %v3753_v23 = vmul.f32 -1.442695, %v2026_v4  ;;  %v3755_v37 = vmul.f32 -1.442695, %v2028_v36 }
 0x49a   :  { %v3754_v43 = vmul.f32 -1.442695, %v2027_v35  ;;  %4282 = vpow2.f32 %v3751_v20 }
 0x49b   :  { %4284 = vpow2.f32 %v3753_v23 }
 0x49c   :  { %4286 = vpow2.f32 %v3754_v43 }
 0x49d   :  { %4288 = vtanh.f32 %v2025_v44 }
 0x49e   :  { %4290 = vpow2.f32 %v3752_v24 }
 0x49f   :  { %4292 = vpow2.f32 %v3755_v37 }
 0x4a3   :  { %v4281_v45 = vpop.eup %4280 }
 0x4a4   :  { %v2048_v61 = vadd.f32 1.0, %v4281_v45  ;;  %v4283_v19 = vpop.eup %4282 }
 0x4a5   :  { %v4285_v26 = vpop.eup %4284  ;;  %v2049_v7 = vadd.f32 1.0, %v4283_v19 }
 0x4a6   :  { %4294 = vrcp.f32 %v2048_v61  ;;  %v2051_v8 = vadd.f32 1.0, %v4285_v26  ;;  %v4287_v25 = vpop.eup %4286 }
 0x4a7   :  { %4296 = vtanh.f32 %v2029_v42  ;;  %v2052_v9 = vadd.f32 1.0, %v4287_v25  ;;  %v4289_v49 = vpop.eup %4288 }
 0x4a8   :  { %4298 = vrcp.f32 %v2049_v7  ;;  %v4291_v38 = vpop.eup %4290 }
 0x4a9   :  { %4300 = vrcp.f32 %v2051_v8  ;;  %v4293_v6 = vpop.eup %4292  ;;  %v2050_v52 = vadd.f32 1.0, %v4291_v38 }
 0x4aa   :  { %4302 = vrcp.f32 %v2052_v9  ;;  %v2053_v36 = vadd.f32 1.0, %v4293_v6 }
 0x4ab   :  { %4304 = vrcp.f32 %v2050_v52 }
 0x4b0   :  { %v4295_v17 = vpop.eup %4294 }
 0x4b1   :  { %v4297_v27 = vpop.eup %4296  ;;  %v2070_v21 = vmul.f32 %v4295_v17, %v4289_v49 }
 0x4b2   :  { %v4299_v44 = vpop.eup %4298 }
 0x4b3   :  { %v4301_v39 = vpop.eup %4300  ;;  %v2068_v12 = vmul.f32 %v4299_v44, %v5109_v2 }
 0x4b4   :  { %v2071_v40 = vmul.f32 %v4301_v39, %v4297_v27  ;;  %v4303_v3 = vpop.eup %4302 }
 0x4b5   :  { %v5159_v4 = vadd.f32 %v2070_v21, %v2068_v12  ;;  %v2069_v41 = vmul.f32 %v4303_v3, %v5113_v5  ;;  %v4305_v20 = vpop.eup %4304 }
 0x4b7   :  { %4306 = vtanh.f32 %v5159_v4  ;;  %v5163_v34 = vadd.f32 %v2071_v40, %v2069_v41 }
 0x4b8   :  { %4308 = vrcp.f32 %v2053_v36 }
 0x4b9   :  { %4310 = vtanh.f32 %v5163_v34 }
 0x4c1   :  { %v4307_v35 = vpop.eup %4306 }
 0x4c2   :  { %v4309_v42 = vpop.eup %4308  ;;  %v2076_v2 = vmul.f32 %v4307_v35, %v4305_v20 }
 0x4c3   :  { %v4311_v23 = vpop.eup %4310 }
 0x4c4   :  { %v2077_v43 = vmul.f32 %v4311_v23, %v4309_v42 }
 0x4c6   :  { %v2078_v24 = vpack.c.bf16 %v2077_v43, %v2076_v2 }
 0x4c8   :  { %3953 = vst [vmem:[#allocation13 + $0x18] sm:$0xff] %v2078_v24   ;;  %2321 = vmatmul.mubr.bf16.vlgmr.msra.gmra.mrb[48].mxu0 %v2078_v24  ;;  %2364 = vmatmul.mubr.bf16.vlgmr.msra.gmra.mrb[48].mxu1 %v2078_v24 }
 0x4c9   :  { %2649 = vmatpush1.bf16.msra.mxu0 %v4956_v30  ;;  %2692 = vmatpush1.bf16.msra.mxu1 %v4958_v53  ;;  %v5387_v30 = vld [vmem:[#allocation20_spill] sm:$0xff] }
 0x4ca   :  { %2650 = vmatprep.subr.bf16.mxu0 %v4964_v10  ;;  %2693 = vmatprep.subr.bf16.mxu1 %v4966_v18  ;;  %v2374_v53 = vunpack.c.l.bf16 %v5387_v30  ;;  %v5388_v10 = vld [vmem:[#allocation21_spill] sm:$0xff]  ;;  %v2378_v45 = vunpack.c.h.bf16 %v5387_v30 }
 0x4cb   :  { %2680 = vmatprep.mubr.bf16.mxu0 %v5384_v33  ;;  %2723 = vmatprep.mubr.bf16.mxu1 %v5384_v33  ;;  %v2376_v18 = vunpack.c.l.bf16 %v5388_v10  ;;  %v2380_v61 = vunpack.c.h.bf16 %v5388_v10 }
 0x4cd   :  { %2651 = vmatpush1.bf16.msra.mxu0 %v4968_v0  ;;  %2694 = vmatpush1.bf16.msra.mxu1 %v4970_v31 }
 0x4ce   :  { %2652 = vmatprep.subr.bf16.mxu0 %v4976_v28  ;;  %2695 = vmatprep.subr.bf16.mxu1 %v5044_v50  ;;  %v5389_v28 = vld [vmem:[#allocation22_spill] sm:$0xff] }
 0x4cf   :  { %v2379_v25 = vunpack.c.h.bf16 %v5389_v28 }
 0x4d1   :  { %2653 = vmatpush1.bf16.msra.mxu0 %v4979_v11  ;;  %2696 = vmatpush1.bf16.msra.mxu1 %v5046_v13  ;;  %v2375_v11 = vunpack.c.l.bf16 %v5389_v28 }
 0x4d2   :  { %2654 = vmatprep.subr.bf16.mxu0 %v4984_v32  ;;  %2697 = vmatprep.subr.bf16.mxu1 %v5050_v22  ;;  %v5390_v32 = vld [vmem:[#allocation23_spill] sm:$0xff] }
 0x4d3   :  { %v2381_v9 = vunpack.c.h.bf16 %v5390_v32 }
 0x4d5   :  { %2655 = vmatpush1.bf16.msra.mxu0 %v4987_v16  ;;  %2698 = vmatpush1.bf16.msra.mxu1 %v5052_v47  ;;  %v2377_v16 = vunpack.c.l.bf16 %v5390_v32 }
 0x4d6   :  { %2656 = vmatprep.subr.bf16.mxu0 %v4994_v29  ;;  %2699 = vmatprep.subr.bf16.mxu1 %v5058_v15 }
 0x4d9   :  { %2657 = vmatpush1.bf16.msra.mxu0 %v4992_v46  ;;  %2700 = vmatpush1.bf16.msra.mxu1 %v5056_v14 }
 0x4da   :  { %2658 = vmatprep.subr.bf16.mxu0 %v5062_v51  ;;  %2701 = vmatprep.subr.bf16.mxu1 %v5064_v54 }
 0x4dd   :  { %2659 = vmatpush1.bf16.msra.mxu0 %v5060_v48  ;;  %2702 = vmatpush1.bf16.msra.mxu1 %v5071_v56 }
 0x4de   :  { %2660 = vmatprep.subr.bf16.mxu0 %v5067_v55  ;;  %2703 = vmatprep.subr.bf16.mxu1 %v5077_v59 }
 0x4e1   :  { %2661 = vmatpush1.bf16.msra.mxu0 %v5075_v57  ;;  %2704 = vmatpush1.bf16.msra.mxu1 %v5083_v60 }
 0x4e2   :  { %2662 = vmatprep.subr.bf16.mxu0 %v5080_v58  ;;  %2705 = vmatprep.subr.bf16.mxu1 %v5089_v63 }
 0x4e5   :  { %2663 = vmatpush1.bf16.msra.mxu0 %v5087_v62  ;;  %2706 = vmatpush1.bf16.msra.mxu1 %v5093_v1 }
 0x59b   :  { %v2322_v0 = vpop.f32.mrb[48].mxu0  ;;  %v2365_v31 = vpop.f32.mrb[48].mxu1 }
 0x59c   :  { %v2382_v46 = vadd.f32 %v2374_v53, %v2322_v0  ;;  %v2384_v29 = vadd.f32 %v2376_v18, %v2365_v31  ;;  %v2324_v5 = vpop.f32.mrb[49].mxu0  ;;  %v2367_v37 = vpop.f32.mrb[49].mxu1 }
 0x59d   :  { %v2383_v19 = vadd.f32 %v2375_v11, %v2324_v5  ;;  %v2385_v26 = vadd.f32 %v2377_v16, %v2367_v37  ;;  %v2326_v7 = vpop.f32.mrb[50].mxu0  ;;  %v2369_v8 = vpop.f32.mrb[50].mxu1 }
 0x59e   :  { %v3790_v49 = vmul.f32 -1.442695, %v2382_v46  ;;  %v2386_v38 = vadd.f32 %v2378_v45, %v2326_v7  ;;  %v2388_v6 = vadd.f32 %v2380_v61, %v2369_v8  ;;  %v2328_v17 = vpop.f32.mrb[51].mxu0  ;;  %v2371_v27 = vpop.f32.mrb[51].mxu1  ;;  %v3792_v40 = vmul.f32 -1.442695, %v2384_v29 }
 0x59f   :  { %v3791_v21 = vmul.f32 -1.442695, %v2383_v19  ;;  %v2387_v44 = vadd.f32 %v2379_v25, %v2328_v17  ;;  %v2389_v39 = vadd.f32 %v2381_v9, %v2371_v27  ;;  %v4141_v9 = vld [vmem:[#allocation10 + $0xc] ss:$16 sps:$4 sm:$0xff]   ;;  %v5226_v27 = vld [vmem:[#allocation10 + $0x20] ss:$16 sps:$4 sm:$0xff]  }
 0x5a0   :  { %4312 = vpow2.f32 %v3790_v49  ;;  %v3793_v52 = vmul.f32 -1.442695, %v2386_v38  ;;  %v3795_v3 = vmul.f32 -1.442695, %v2388_v6  ;;  %v5216_v49 = vld [vmem:[#allocation10] ss:$16 sps:$4 sm:$0xff]   ;;  %3051 = vmatprep.subr.bf16.mxu1 %v4141_v9 }
 0x5a1   :  { %v3794_v12 = vmul.f32 -1.442695, %v2387_v44  ;;  %4314 = vpow2.f32 %v3791_v21  ;;  %v5218_v38 = vld [vmem:[#allocation10 + $0x8] ss:$16 sps:$4 sm:$0xff]   ;;  %v5222_v6 = vld [vmem:[#allocation10 + $0x24] ss:$16 sps:$4 sm:$0xff]  }
 0x5a2   :  { %4316 = vpow2.f32 %v3793_v52  ;;  %v5224_v17 = vld [vmem:[#allocation10 + $0x2c] ss:$16 sps:$4 sm:$0xff]   ;;  %v5228_v21 = vld [vmem:[#allocation10 + $0x28] ss:$16 sps:$4 sm:$0xff]   ;;  %v5234_v44 = vld [vmem:[#allocation10 + $0x44] ss:$16 sps:$4 sm:$0xff]  }
 0x5a3   :  { %4318 = vpow2.f32 %v3794_v12  ;;  %v5242_v52 = vld [vmem:[#allocation10 + $0x64] ss:$16 sps:$4 sm:$0xff]   ;;  %v5245_v12 = vld [vmem:[#allocation10 + $0x60] ss:$16 sps:$4 sm:$0xff]  }
 0x5a4   :  { %4320 = vtanh.f32 %v2385_v26 }
 0x5a5   :  { %4322 = vpow2.f32 %v3792_v40  ;;  %v5252_v40 = vld [vmem:[#allocation10 + $0x84] ss:$16 sps:$4 sm:$0xff]  }
 0x5a6   :  { %4324 = vpow2.f32 %v3795_v3 }
 0x5aa   :  { %v4313_v36 = vpop.eup %4312 }
 0x5ab   :  { %v2408_v41 = vadd.f32 1.0, %v4313_v36  ;;  %v4315_v20 = vpop.eup %4314 }
 0x5ac   :  { %v4317_v35 = vpop.eup %4316  ;;  %v2409_v42 = vadd.f32 1.0, %v4315_v20 }
 0x5ad   :  { %4326 = vrcp.f32 %v2408_v41  ;;  %v2411_v23 = vadd.f32 1.0, %v4317_v35  ;;  %v4319_v2 = vpop.eup %4318 }
 0x5ae   :  { %4328 = vtanh.f32 %v2389_v39  ;;  %v2412_v43 = vadd.f32 1.0, %v4319_v2  ;;  %v4321_v24 = vpop.eup %4320  ;;  %v5237_v39 = vld [vmem:[#allocation10 + $0x40] ss:$16 sps:$4 sm:$0xff]  }
 0x5af   :  { %4330 = vrcp.f32 %v2409_v42  ;;  %v4323_v30 = vpop.eup %4322 }
 0x5b0   :  { %4332 = vrcp.f32 %v2411_v23  ;;  %v4325_v53 = vpop.eup %4324  ;;  %v2410_v11 = vadd.f32 1.0, %v4323_v30 }
 0x5b1   :  { %4334 = vrcp.f32 %v2412_v43  ;;  %v2413_v5 = vadd.f32 1.0, %v4325_v53 }
 0x5b2   :  { %4336 = vrcp.f32 %v2410_v11 }
 0x5b7   :  { %v4327_v10 = vpop.eup %4326 }
 0x5b8   :  { %v4329_v18 = vpop.eup %4328  ;;  %v2430_v0 = vmul.f32 %v4327_v10, %v4321_v24 }
 0x5b9   :  { %v4331_v31 = vpop.eup %4330 }
 0x5ba   :  { %v4333_v28 = vpop.eup %4332  ;;  %v2428_v32 = vmul.f32 %v4331_v31, %v5159_v4 }
 0x5bb   :  { %v2431_v16 = vmul.f32 %v4333_v28, %v4329_v18  ;;  %v4335_v46 = vpop.eup %4334 }
 0x5bc   :  { %v5207_v29 = vadd.f32 %v2430_v0, %v2428_v32  ;;  %v2429_v37 = vmul.f32 %v4335_v46, %v5163_v34  ;;  %v4337_v61 = vpop.eup %4336  ;;  %v4138_v34 = vld [vmem:[#allocation10 + $0x4] ss:$16 sps:$4 sm:$0xff]  }
 0x5bd   :  { %3008 = vmatprep.subr.bf16.mxu0 %v4138_v34 }
 0x5be   :  { %4338 = vtanh.f32 %v5207_v29  ;;  %v5211_v45 = vadd.f32 %v2431_v16, %v2429_v37 }
 0x5bf   :  { %4340 = vrcp.f32 %v2413_v5 }
 0x5c0   :  { %4342 = vtanh.f32 %v5211_v45 }
 0x5c8   :  { %v4339_v19 = vpop.eup %4338 }
 0x5c9   :  { %v4341_v26 = vpop.eup %4340  ;;  %v2436_v4 = vmul.f32 %v4339_v19, %v4337_v61 }
 0x5ca   :  { %v4343_v7 = vpop.eup %4342 }
 0x5cb   :  { %v2437_v8 = vmul.f32 %v4343_v7, %v4341_v26 }
 0x5cd   :  { %v2438_v25 = vpack.c.bf16 %v2437_v8, %v2436_v4 }
 0x5cf   :  { %3958 = vst [vmem:[#allocation13 + $0x20] sm:$0xff] %v2438_v25   ;;  %2681 = vmatmul.mubr.bf16.vlgmr.msra.gmra.mrb[52].mxu0 %v2438_v25  ;;  %2724 = vmatmul.mubr.bf16.vlgmr.msra.gmra.mrb[52].mxu1 %v2438_v25 }
 0x5d0   :  { %3040 = vmatprep.mubr.bf16.mxu0 %v5384_v33  ;;  %3083 = vmatprep.mubr.bf16.mxu1 %v5384_v33 }
 0x5d1   :  { %3009 = vmatpush1.bf16.msra.mxu0 %v5216_v49  ;;  %3052 = vmatpush1.bf16.msra.mxu1 %v5218_v38 }
 0x5d2   :  { %3010 = vmatprep.subr.bf16.mxu0 %v5222_v6  ;;  %3053 = vmatprep.subr.bf16.mxu1 %v5224_v17 }
 0x5d5   :  { %3011 = vmatpush1.bf16.msra.mxu0 %v5226_v27  ;;  %3054 = vmatpush1.bf16.msra.mxu1 %v5228_v21 }
 0x5d6   :  { %3055 = vmatprep.subr.bf16.mxu1 %v5044_v50  ;;  %3012 = vmatprep.subr.bf16.mxu0 %v5234_v44  ;;  %v5250_v50 = vld [vmem:[#allocation10 + $0x80] ss:$16 sps:$4 sm:$0xff]  }
 0x5d9   :  { %3013 = vmatpush1.bf16.msra.mxu0 %v5237_v39  ;;  %3056 = vmatpush1.bf16.msra.mxu1 %v5046_v13  ;;  %v5391_v13 = vld [vmem:[#allocation24_spill] sm:$0xff] }
 0x5da   :  { %3057 = vmatprep.subr.bf16.mxu1 %v5050_v22  ;;  %3014 = vmatprep.subr.bf16.mxu0 %v5242_v52  ;;  %v2734_v22 = vunpack.c.l.bf16 %v5391_v13 }
 0x5dd   :  { %3015 = vmatpush1.bf16.msra.mxu0 %v5245_v12  ;;  %3058 = vmatpush1.bf16.msra.mxu1 %v5052_v47  ;;  %v5392_v47 = vld [vmem:[#allocation25_spill] sm:$0xff] }
 0x5de   :  { %3059 = vmatprep.subr.bf16.mxu1 %v5058_v15  ;;  %3016 = vmatprep.subr.bf16.mxu0 %v5252_v40 }
 0x5e1   :  { %3017 = vmatpush1.bf16.msra.mxu0 %v5250_v50  ;;  %3060 = vmatpush1.bf16.msra.mxu1 %v5056_v14  ;;  %v2736_v14 = vunpack.c.l.bf16 %v5392_v47 }
 0x5e2   :  { %3018 = vmatprep.subr.bf16.mxu0 %v5062_v51  ;;  %3061 = vmatprep.subr.bf16.mxu1 %v5064_v54  ;;  %v5393_v51 = vld [vmem:[#allocation26_spill] sm:$0xff] }
 0x5e3   :  { %v2735_v54 = vunpack.c.l.bf16 %v5393_v51  ;;  %v2739_v20 = vunpack.c.h.bf16 %v5393_v51 }
 0x5e5   :  { %3019 = vmatpush1.bf16.msra.mxu0 %v5060_v48  ;;  %3062 = vmatpush1.bf16.msra.mxu1 %v5071_v56 }
 0x5e6   :  { %3020 = vmatprep.subr.bf16.mxu0 %v5067_v55  ;;  %3063 = vmatprep.subr.bf16.mxu1 %v5077_v59  ;;  %v5394_v55 = vld [vmem:[#allocation27_spill] sm:$0xff] }
 0x5e7   :  { %v2737_v56 = vunpack.c.l.bf16 %v5394_v55  ;;  %v2741_v35 = vunpack.c.h.bf16 %v5394_v55 }
 0x5e9   :  { %3021 = vmatpush1.bf16.msra.mxu0 %v5075_v57  ;;  %3064 = vmatpush1.bf16.msra.mxu1 %v5083_v60 }
 0x5ea   :  { %3022 = vmatprep.subr.bf16.mxu0 %v5080_v58  ;;  %3065 = vmatprep.subr.bf16.mxu1 %v5089_v63  ;;  %v2740_v63 = vunpack.c.h.bf16 %v5392_v47 }
 0x5ed   :  { %3023 = vmatpush1.bf16.msra.mxu0 %v5087_v62  ;;  %3066 = vmatpush1.bf16.msra.mxu1 %v5093_v1  ;;  %v2738_v62 = vunpack.c.h.bf16 %v5391_v13 }
 0x5ee   :  { %3368 = vmatprep.subr.bf16.mxu0 %v4138_v34  ;;  %3411 = vmatprep.subr.bf16.mxu1 %v4141_v9 }
 0x6a2   :  { %v2682_v15 = vpop.f32.mrb[52].mxu0  ;;  %v2725_v48 = vpop.f32.mrb[52].mxu1 }
 0x6a3   :  { %v2742_v57 = vadd.f32 %v2734_v22, %v2682_v15  ;;  %v2744_v59 = vadd.f32 %v2736_v14, %v2725_v48  ;;  %v2684_v58 = vpop.f32.mrb[53].mxu0  ;;  %v2727_v60 = vpop.f32.mrb[53].mxu1 }
 0x6a4   :  { %v2743_v1 = vadd.f32 %v2735_v54, %v2684_v58  ;;  %v2745_v3 = vadd.f32 %v2737_v56, %v2727_v60  ;;  %v2686_v36 = vpop.f32.mrb[54].mxu0  ;;  %v2729_v41 = vpop.f32.mrb[54].mxu1 }
 0x6a5   :  { %v3830_v42 = vmul.f32 -1.442695, %v2742_v57  ;;  %v2746_v23 = vadd.f32 %v2738_v62, %v2686_v36  ;;  %v2748_v2 = vadd.f32 %v2740_v63, %v2729_v41  ;;  %v2688_v43 = vpop.f32.mrb[55].mxu0  ;;  %v2731_v24 = vpop.f32.mrb[55].mxu1  ;;  %v3832_v31 = vmul.f32 -1.442695, %v2744_v59 }
 0x6a6   :  { %v3831_v30 = vmul.f32 -1.442695, %v2743_v1  ;;  %v2747_v53 = vadd.f32 %v2739_v20, %v2688_v43  ;;  %v2749_v10 = vadd.f32 %v2741_v35, %v2731_v24  ;;  %v4175_v63 = vld [vmem:[#allocation10 + $0xc8] ss:$16 sps:$4 sm:$0xff]   ;;  %v4178_v1 = vld [vmem:[#allocation10 + $0xe0] ss:$16 sps:$4 sm:$0xff]  }
 0x6a7   :  { %4344 = vpow2.f32 %v3830_v42  ;;  %v3833_v18 = vmul.f32 -1.442695, %v2746_v23  ;;  %v3835_v28 = vmul.f32 -1.442695, %v2748_v2  ;;  %v4181_v36 = vld [vmem:[#allocation10 + $0xe8] ss:$16 sps:$4 sm:$0xff]  }
 0x6a8   :  { %v3834_v0 = vmul.f32 -1.442695, %v2747_v53  ;;  %4346 = vpow2.f32 %v3831_v30  ;;  %v5395_v41 = vld [vmem:[#allocation28_spill] sm:$0xff]  ;;  %v5396_v35 = vld [vmem:[#allocation29_spill] sm:$0xff]  ;;  %v5397_v43 = vld [vmem:[#allocation30_spill] sm:$0xff] }
 0x6a9   :  { %4348 = vpow2.f32 %v3833_v18  ;;  %v3094_v20 = vunpack.c.l.bf16 %v5395_v41  ;;  %v3096_v42 = vunpack.c.l.bf16 %v5396_v35  ;;  %v3095_v24 = vunpack.c.l.bf16 %v5397_v43  ;;  %v5398_v30 = vld [vmem:[#allocation31_spill] sm:$0xff] }
 0x6aa   :  { %4350 = vpow2.f32 %v3834_v0  ;;  %v3097_v53 = vunpack.c.l.bf16 %v5398_v30 }
 0x6ab   :  { %4352 = vtanh.f32 %v2745_v3  ;;  %v4183_v3 = vld [vmem:[#allocation10 + $0xec] ss:$16 sps:$4 sm:$0xff]  }
 0x6ac   :  { %4354 = vpow2.f32 %v3832_v31 }
 0x6ad   :  { %4356 = vpow2.f32 %v3835_v28  ;;  %v3098_v28 = vunpack.c.h.bf16 %v5395_v41 }
 0x6b1   :  { %v4345_v11 = vpop.eup %4344 }
 0x6b2   :  { %v2768_v32 = vadd.f32 1.0, %v4345_v11  ;;  %v4347_v16 = vpop.eup %4346  ;;  %v3100_v11 = vunpack.c.h.bf16 %v5396_v35  ;;  %v5399_v35 = vld [vmem:[#allocation32_spill] sm:$0xff] }
 0x6b3   :  { %v4349_v46 = vpop.eup %4348  ;;  %v2769_v5 = vadd.f32 1.0, %v4347_v16 }
 0x6b4   :  { %4358 = vrcp.f32 %v2768_v32  ;;  %v2771_v37 = vadd.f32 1.0, %v4349_v46  ;;  %v4351_v61 = vpop.eup %4350 }
 0x6b5   :  { %4360 = vtanh.f32 %v2749_v10  ;;  %v2772_v19 = vadd.f32 1.0, %v4351_v61  ;;  %v4353_v26 = vpop.eup %4352  ;;  %v3101_v61 = vunpack.c.h.bf16 %v5398_v30 }
 0x6b6   :  { %4362 = vrcp.f32 %v2769_v5  ;;  %v4355_v7 = vpop.eup %4354 }
 0x6b7   :  { %4364 = vrcp.f32 %v2771_v37  ;;  %v4357_v4 = vpop.eup %4356  ;;  %v2770_v22 = vadd.f32 1.0, %v4355_v7  ;;  %v3099_v37 = vunpack.c.h.bf16 %v5397_v43 }
 0x6b8   :  { %4366 = vrcp.f32 %v2772_v19  ;;  %v2773_v51 = vadd.f32 1.0, %v4357_v4 }
 0x6b9   :  { %4368 = vrcp.f32 %v2770_v22 }
 0x6be   :  { %v4359_v8 = vpop.eup %4358 }
 0x6bf   :  { %v4361_v25 = vpop.eup %4360  ;;  %v2790_v34 = vmul.f32 %v4359_v8, %v4353_v26 }
 0x6c0   :  { %v4363_v9 = vpop.eup %4362 }
 0x6c1   :  { %v4365_v13 = vpop.eup %4364  ;;  %v2788_v47 = vmul.f32 %v4363_v9, %v5207_v29 }
 0x6c2   :  { %v2791_v14 = vmul.f32 %v4365_v13, %v4361_v25  ;;  %v4367_v15 = vpop.eup %4366 }
 0x6c3   :  { %v5279_v48 = vadd.f32 %v2790_v34, %v2788_v47  ;;  %v2789_v54 = vmul.f32 %v4367_v15, %v5211_v45  ;;  %v4369_v56 = vpop.eup %4368  ;;  %v4159_v45 = vld [vmem:[#allocation10 + $0x4c] ss:$16 sps:$4 sm:$0xff]  }
 0x6c5   :  { %4370 = vtanh.f32 %v5279_v48  ;;  %v5283_v55 = vadd.f32 %v2791_v14, %v2789_v54 }
 0x6c6   :  { %4372 = vrcp.f32 %v2773_v51 }
 0x6c7   :  { %4374 = vtanh.f32 %v5283_v55 }
 0x6cf   :  { %v4371_v57 = vpop.eup %4370 }
 0x6d0   :  { %v4373_v59 = vpop.eup %4372  ;;  %v2796_v29 = vmul.f32 %v4371_v57, %v4369_v56 }
 0x6d1   :  { %v4375_v58 = vpop.eup %4374 }
 0x6d2   :  { %v2797_v60 = vmul.f32 %v4375_v58, %v4373_v59 }
 0x6d4   :  { %v2798_v62 = vpack.c.bf16 %v2797_v60, %v2796_v29 }
 0x6d6   :  { %3963 = vst [vmem:[#allocation13 + $0x28] sm:$0xff] %v2798_v62   ;;  %3041 = vmatmul.mubr.bf16.vlgmr.msra.gmra.mrb[56].mxu0 %v2798_v62  ;;  %3084 = vmatmul.mubr.bf16.vlgmr.msra.gmra.mrb[56].mxu1 %v2798_v62 }
 0x6d7   :  { %3369 = vmatpush1.bf16.msra.mxu0 %v5216_v49  ;;  %3412 = vmatpush1.bf16.msra.mxu1 %v5218_v38  ;;  %v4157_v49 = vld [vmem:[#allocation10 + $0x48] ss:$16 sps:$4 sm:$0xff]  }
 0x6d8   :  { %3370 = vmatprep.subr.bf16.mxu0 %v5222_v6  ;;  %3413 = vmatprep.subr.bf16.mxu1 %v5224_v17  ;;  %v4160_v38 = vld [vmem:[#allocation10 + $0x68] ss:$16 sps:$4 sm:$0xff]   ;;  %v4165_v17 = vld [vmem:[#allocation10 + $0x8c] ss:$16 sps:$4 sm:$0xff]  }
 0x6d9   :  { %3400 = vmatprep.mubr.bf16.mxu0 %v5384_v33  ;;  %3443 = vmatprep.mubr.bf16.mxu1 %v5384_v33  ;;  %v4162_v33 = vld [vmem:[#allocation10 + $0x6c] ss:$16 sps:$4 sm:$0xff]   ;;  %v4163_v6 = vld [vmem:[#allocation10 + $0x88] ss:$16 sps:$4 sm:$0xff]  }
 0x6db   :  { %3371 = vmatpush1.bf16.msra.mxu0 %v5226_v27  ;;  %3414 = vmatpush1.bf16.msra.mxu1 %v5228_v21  ;;  %v4166_v27 = vld [vmem:[#allocation10 + $0xa0] ss:$16 sps:$4 sm:$0xff]   ;;  %v4168_v21 = vld [vmem:[#allocation10 + $0xa4] ss:$16 sps:$4 sm:$0xff]  }
 0x6dc   :  { %3372 = vmatprep.subr.bf16.mxu0 %v5234_v44  ;;  %3415 = vmatprep.subr.bf16.mxu1 %v4159_v45  ;;  %v4171_v44 = vld [vmem:[#allocation10 + $0xac] ss:$16 sps:$4 sm:$0xff]  }
 0x6df   :  { %3373 = vmatpush1.bf16.msra.mxu0 %v5237_v39  ;;  %3416 = vmatpush1.bf16.msra.mxu1 %v4157_v49  ;;  %v4174_v39 = vld [vmem:[#allocation10 + $0xc4] ss:$16 sps:$4 sm:$0xff]  }
 0x6e0   :  { %3374 = vmatprep.subr.bf16.mxu0 %v5242_v52  ;;  %3417 = vmatprep.subr.bf16.mxu1 %v4162_v33  ;;  %v4169_v52 = vld [vmem:[#allocation10 + $0xa8] ss:$16 sps:$4 sm:$0xff]  }
 0x6e3   :  { %3375 = vmatpush1.bf16.msra.mxu0 %v5245_v12  ;;  %3418 = vmatpush1.bf16.msra.mxu1 %v4160_v38  ;;  %v4172_v12 = vld [vmem:[#allocation10 + $0xc0] ss:$16 sps:$4 sm:$0xff]  }
 0x6e4   :  { %3376 = vmatprep.subr.bf16.mxu0 %v5252_v40  ;;  %3419 = vmatprep.subr.bf16.mxu1 %v4165_v17  ;;  %v4180_v40 = vld [vmem:[#allocation10 + $0xe4] ss:$16 sps:$4 sm:$0xff]  }
 0x6e7   :  { %3377 = vmatpush1.bf16.msra.mxu0 %v5250_v50  ;;  %3420 = vmatpush1.bf16.msra.mxu1 %v4163_v6  ;;  %v4177_v50 = vld [vmem:[#allocation10 + $0xcc] ss:$16 sps:$4 sm:$0xff]  }
 0x6e8   :  { %3378 = vmatprep.subr.bf16.mxu0 %v4168_v21  ;;  %3421 = vmatprep.subr.bf16.mxu1 %v4171_v44 }
 0x6eb   :  { %3379 = vmatpush1.bf16.msra.mxu0 %v4166_v27  ;;  %3422 = vmatpush1.bf16.msra.mxu1 %v4169_v52 }
 0x6ec   :  { %3380 = vmatprep.subr.bf16.mxu0 %v4174_v39  ;;  %3423 = vmatprep.subr.bf16.mxu1 %v4177_v50 }
 0x6ef   :  { %3381 = vmatpush1.bf16.msra.mxu0 %v4172_v12  ;;  %3424 = vmatpush1.bf16.msra.mxu1 %v4175_v63 }
 0x6f0   :  { %3382 = vmatprep.subr.bf16.mxu0 %v4180_v40  ;;  %3425 = vmatprep.subr.bf16.mxu1 %v4183_v3 }
 0x6f3   :  { %3383 = vmatpush1.bf16.msra.mxu0 %v4178_v1  ;;  %3426 = vmatpush1.bf16.msra.mxu1 %v4181_v36 }
 0x7a9   :  { %v3042_v23 = vpop.f32.mrb[56].mxu0  ;;  %v3085_v2 = vpop.f32.mrb[56].mxu1 }
 0x7aa   :  { %v3102_v10 = vadd.f32 %v3094_v20, %v3042_v23  ;;  %v3104_v18 = vadd.f32 %v3096_v42, %v3085_v2  ;;  %v3044_v0 = vpop.f32.mrb[57].mxu0  ;;  %v3087_v31 = vpop.f32.mrb[57].mxu1  ;;  %v5400_v42 = vld [vmem:[#allocation33_spill] sm:$0xff] }
 0x7ab   :  { %v3103_v32 = vadd.f32 %v3095_v24, %v3044_v0  ;;  %v3105_v16 = vadd.f32 %v3097_v53, %v3087_v31  ;;  %v3046_v46 = vpop.f32.mrb[58].mxu0  ;;  %v3089_v5 = vpop.f32.mrb[58].mxu1  ;;  %v3456_v23 = vunpack.c.l.bf16 %v5400_v42  ;;  %v5401_v24 = vld [vmem:[#allocation34_spill] sm:$0xff]  ;;  %v5402_v53 = vld [vmem:[#allocation35_spill] sm:$0xff] }
 0x7ac   :  { %v3870_v19 = vmul.f32 -1.442695, %v3102_v10  ;;  %v3106_v26 = vadd.f32 %v3098_v28, %v3046_v46  ;;  %v3108_v7 = vadd.f32 %v3100_v11, %v3089_v5  ;;  %v3048_v4 = vpop.f32.mrb[59].mxu0  ;;  %v3091_v8 = vpop.f32.mrb[59].mxu1  ;;  %v3872_v47 = vmul.f32 -1.442695, %v3104_v18 }
 0x7ad   :  { %v3871_v25 = vmul.f32 -1.442695, %v3103_v32  ;;  %v3107_v34 = vadd.f32 %v3099_v37, %v3048_v4  ;;  %v3109_v9 = vadd.f32 %v3101_v61, %v3091_v8  ;;  %v3455_v30 = vunpack.c.l.bf16 %v5401_v24 }
 0x7ae   :  { %4376 = vpow2.f32 %v3870_v19  ;;  %v3873_v13 = vmul.f32 -1.442695, %v3106_v26  ;;  %v3875_v14 = vmul.f32 -1.442695, %v3108_v7  ;;  %v3457_v10 = vunpack.c.l.bf16 %v5402_v53 }
 0x7af   :  { %v3874_v22 = vmul.f32 -1.442695, %v3107_v34  ;;  %4378 = vpow2.f32 %v3871_v25  ;;  %v3458_v11 = vunpack.c.h.bf16 %v5399_v35  ;;  %v3460_v32 = vunpack.c.h.bf16 %v5400_v42 }
 0x7b0   :  { %4380 = vpow2.f32 %v3873_v13  ;;  %v3459_v61 = vunpack.c.h.bf16 %v5401_v24  ;;  %v3461_v19 = vunpack.c.h.bf16 %v5402_v53 }
 0x7b1   :  { %4382 = vpow2.f32 %v3874_v22 }
 0x7b2   :  { %4384 = vtanh.f32 %v3105_v16 }
 0x7b3   :  { %4386 = vpow2.f32 %v3872_v47 }
 0x7b4   :  { %4388 = vpow2.f32 %v3875_v14 }
 0x7b8   :  { %v4377_v15 = vpop.eup %4376 }
 0x7b9   :  { %v3128_v51 = vadd.f32 1.0, %v4377_v15  ;;  %v4379_v54 = vpop.eup %4378 }
 0x7ba   :  { %v4381_v56 = vpop.eup %4380  ;;  %v3129_v57 = vadd.f32 1.0, %v4379_v54 }
 0x7bb   :  { %4390 = vrcp.f32 %v3128_v51  ;;  %v3131_v59 = vadd.f32 1.0, %v4381_v56  ;;  %v4383_v58 = vpop.eup %4382 }
 0x7bc   :  { %4392 = vtanh.f32 %v3109_v9  ;;  %v3132_v29 = vadd.f32 1.0, %v4383_v58  ;;  %v4385_v60 = vpop.eup %4384 }
 0x7bd   :  { %4394 = vrcp.f32 %v3129_v57  ;;  %v4387_v62 = vpop.eup %4386 }
 0x7be   :  { %4396 = vrcp.f32 %v3131_v59  ;;  %v4389_v45 = vpop.eup %4388  ;;  %v3130_v27 = vadd.f32 1.0, %v4387_v62 }
 0x7bf   :  { %4398 = vrcp.f32 %v3132_v29  ;;  %v3133_v12 = vadd.f32 1.0, %v4389_v45 }
 0x7c0   :  { %4400 = vrcp.f32 %v3130_v27 }
 0x7c5   :  { %v4391_v49 = vpop.eup %4390 }
 0x7c6   :  { %v4393_v33 = vpop.eup %4392  ;;  %v3150_v38 = vmul.f32 %v4391_v49, %v4385_v60 }
 0x7c7   :  { %v4395_v6 = vpop.eup %4394 }
 0x7c8   :  { %v4397_v17 = vpop.eup %4396  ;;  %v3148_v21 = vmul.f32 %v4395_v6, %v5279_v48 }
 0x7c9   :  { %v3151_v44 = vmul.f32 %v4397_v17, %v4393_v33  ;;  %v4399_v39 = vpop.eup %4398 }
 0x7ca   :  { %v5309_v52 = vadd.f32 %v3150_v38, %v3148_v21  ;;  %v3149_v50 = vmul.f32 %v4399_v39, %v5283_v55  ;;  %v4401_v63 = vpop.eup %4400  ;;  %v3454_v55 = vunpack.c.l.bf16 %v5399_v35 }
 0x7cc   :  { %4402 = vtanh.f32 %v5309_v52  ;;  %v5313_v40 = vadd.f32 %v3151_v44, %v3149_v50 }
 0x7cd   :  { %4404 = vrcp.f32 %v3133_v12 }
 0x7ce   :  { %4406 = vtanh.f32 %v5313_v40 }
 0x7d6   :  { %v4403_v1 = vpop.eup %4402 }
 0x7d7   :  { %v4405_v3 = vpop.eup %4404  ;;  %v3156_v48 = vmul.f32 %v4403_v1, %v4401_v63 }
 0x7d8   :  { %v4407_v36 = vpop.eup %4406 }
 0x7d9   :  { %v3157_v41 = vmul.f32 %v4407_v36, %v4405_v3 }
 0x7db   :  { %v3158_v20 = vpack.c.bf16 %v3157_v41, %v3156_v48 }
 0x7dd   :  { %3968 = vst [vmem:[#allocation13 + $0x30] sm:$0xff] %v3158_v20   ;;  %3401 = vmatmul.mubr.bf16.vlgmr.msra.gmra.mrb[60].mxu0 %v3158_v20  ;;  %3444 = vmatmul.mubr.bf16.vlgmr.msra.gmra.mrb[60].mxu1 %v3158_v20 }
 0x8b0   :  { %v3402_v2 = vpop.f32.mrb[60].mxu0  ;;  %v3445_v43 = vpop.f32.mrb[60].mxu1 }
 0x8b1   :  { %v3462_v18 = vadd.f32 %v3454_v55, %v3402_v2  ;;  %v3464_v0 = vadd.f32 %v3456_v23, %v3445_v43  ;;  %v3404_v31 = vpop.f32.mrb[61].mxu0  ;;  %v3447_v28 = vpop.f32.mrb[61].mxu1 }
 0x8b2   :  { %v3463_v16 = vadd.f32 %v3455_v30, %v3404_v31  ;;  %v3465_v46 = vadd.f32 %v3457_v10, %v3447_v28  ;;  %v3406_v5 = vpop.f32.mrb[62].mxu0  ;;  %v3449_v37 = vpop.f32.mrb[62].mxu1 }
 0x8b3   :  { %v3910_v26 = vmul.f32 -1.442695, %v3462_v18  ;;  %v3466_v7 = vadd.f32 %v3458_v11, %v3406_v5  ;;  %v3468_v4 = vadd.f32 %v3460_v32, %v3449_v37  ;;  %v3408_v8 = vpop.f32.mrb[63].mxu0  ;;  %v3451_v25 = vpop.f32.mrb[63].mxu1  ;;  %v3912_v14 = vmul.f32 -1.442695, %v3464_v0 }
 0x8b4   :  { %v3911_v34 = vmul.f32 -1.442695, %v3463_v16  ;;  %v3467_v9 = vadd.f32 %v3459_v61, %v3408_v8  ;;  %v3469_v13 = vadd.f32 %v3461_v19, %v3451_v25 }
 0x8b5   :  { %4408 = vpow2.f32 %v3910_v26  ;;  %v3913_v22 = vmul.f32 -1.442695, %v3466_v7  ;;  %v3915_v15 = vmul.f32 -1.442695, %v3468_v4 }
 0x8b6   :  { %v3914_v47 = vmul.f32 -1.442695, %v3467_v9  ;;  %4410 = vpow2.f32 %v3911_v34 }
 0x8b7   :  { %4412 = vpow2.f32 %v3913_v22 }
 0x8b8   :  { %4414 = vpow2.f32 %v3914_v47 }
 0x8b9   :  { %4416 = vtanh.f32 %v3465_v46 }
 0x8ba   :  { %4418 = vpow2.f32 %v3912_v14 }
 0x8bb   :  { %4420 = vpow2.f32 %v3915_v15 }
 0x8bf   :  { %v4409_v51 = vpop.eup %4408 }
 0x8c0   :  { %v3488_v54 = vadd.f32 1.0, %v4409_v51  ;;  %v4411_v56 = vpop.eup %4410 }
 0x8c1   :  { %v4413_v57 = vpop.eup %4412  ;;  %v3489_v59 = vadd.f32 1.0, %v4411_v56 }
 0x8c2   :  { %4422 = vrcp.f32 %v3488_v54  ;;  %v3491_v58 = vadd.f32 1.0, %v4413_v57  ;;  %v4415_v29 = vpop.eup %4414 }
 0x8c3   :  { %4424 = vtanh.f32 %v3469_v13  ;;  %v3492_v60 = vadd.f32 1.0, %v4415_v29  ;;  %v4417_v62 = vpop.eup %4416 }
 0x8c4   :  { %4426 = vrcp.f32 %v3489_v59  ;;  %v4419_v45 = vpop.eup %4418 }
 0x8c5   :  { %4428 = vrcp.f32 %v3491_v58  ;;  %v4421_v49 = vpop.eup %4420  ;;  %v3490_v27 = vadd.f32 1.0, %v4419_v45 }
 0x8c6   :  { %4430 = vrcp.f32 %v3492_v60  ;;  %v3493_v63 = vadd.f32 1.0, %v4421_v49 }
 0x8c7   :  { %4432 = vrcp.f32 %v3490_v27 }
 0x8cc   :  { %v4423_v33 = vpop.eup %4422 }
 0x8cd   :  { %v4425_v38 = vpop.eup %4424  ;;  %v3510_v6 = vmul.f32 %v4423_v33, %v4417_v62 }
 0x8ce   :  { %v4427_v17 = vpop.eup %4426 }
 0x8cf   :  { %v4429_v21 = vpop.eup %4428  ;;  %v3508_v44 = vmul.f32 %v4427_v17, %v5309_v52 }
 0x8d0   :  { %v3511_v39 = vmul.f32 %v4429_v21, %v4425_v38  ;;  %v4431_v12 = vpop.eup %4430 }
 0x8d1   :  { %v3512_v50 = vadd.f32 %v3510_v6, %v3508_v44  ;;  %v3509_v1 = vmul.f32 %v4431_v12, %v5313_v40  ;;  %v4433_v36 = vpop.eup %4432 }
 0x8d3   :  { %4434 = vtanh.f32 %v3512_v50  ;;  %v3513_v3 = vadd.f32 %v3511_v39, %v3509_v1 }
 0x8d4   :  { %4436 = vrcp.f32 %v3493_v63 }
 0x8d5   :  { %4438 = vtanh.f32 %v3513_v3 }
 0x8dd   :  { %v4435_v48 = vpop.eup %4434 }
 0x8de   :  { %v3516_v41 = vmul.f32 %v4435_v48, %v4433_v36  ;;  %v4437_v20 = vpop.eup %4436 }
 0x8df   :  { %v4439_v35 = vpop.eup %4438 }
 0x8e0   :  { %v3517_v55 = vmul.f32 %v4439_v35, %v4437_v20 }
 0x8e2   :  { %v3518_v52 = vpack.c.bf16 %v3517_v55, %v3516_v41 }
 0x8e4   :  { %3973 = vst [vmem:[#allocation13 + $0x38] sm:$0xff] %v3518_v52  }
 0x8e5   :  { %4539 = shalt.err (!%p4536_p8)
}
 0x8e6   :  { %s4540_s17 = scalar_lea.hbm %s5345_s4, 1024 }
 0x8e7   :  { %p4541_p9 = scmp.ne.s32.totalorder %s5345_s4, %s4540_s17  ;;  %p4544_p10 = scmp.lt.u32.totalorder %s4540_s17, %s5345_s4 }
 0x8e9   :  { %p4546_p11 = pnand %p4544_p10, %p4541_p9 }
 0x8eb   :  { %4549 = shalt.err (!%p4546_p11)
}
 0x8ec   :  { %3543 = dma.vmem_to_hbm [thread:$0]  %s3538_s26, 1024, %s5345_s4, [#allocation7], %s4562_s1, %s4562_s1, %s4563_s13  }
 0x8ed   :  { %4556 = dma.done.wait [#allocation7], 1024  }
 0x8ee   :  { %4557 = vsyncadd [#allocation7], 4294966272 }
 0x8ef   :  { %3547 = vsyncpa [#allocation6], 1 }
 0x8f0   :  { %3548 = vsyncpa [#allocation9], 1 }
 0x8f1   :  { %3549 = vsyncpa [#allocation12], 1 }
 0x8f2   :  { %3550 = vsyncpa [#allocation7], 1 }

</bundles_post_ra>
